<compile_context>
chip_gen: v7x
topology: tpu7x:2x2x1
jax: 0.10.0
libtpu: 0.0.40
codegen_flags: <defaults>
</compile_context>

<pallas_src>
import functools
from typing import NamedTuple, Optional

import jax
import jax.numpy as jnp
from jax.experimental import pallas as pl
from jax.experimental.pallas import tpu as pltpu


# ----------------------------------------------------------------------------
# Fused batched GEMM Pallas kernel:
#   out[b] = epilogue(A[b] @ W[b] + bias)    (+ per-tile BN sum / sumsq)
# ----------------------------------------------------------------------------

_PALLAS_MIN_M = 16   # below this the pallas_call is pure launch latency


def _round_up(x, m):
    return ((x + m - 1) // m) * m


def _fused_gemm_kernel(*refs, n_k, epilogue, want_stats, tm, m_real):
    if want_stats:
        a_ref, w_ref, bias_ref, o_ref, stats_ref, acc_ref = refs
    else:
        a_ref, w_ref, bias_ref, o_ref, acc_ref = refs

    # program_id must be read at the top level of the kernel (NOT inside a
    # pl.when body) so it never leaks into a cond sub-jaxpr.
    i = pl.program_id(1)      # M-tile index
    k = pl.program_id(2)      # K (reduction) index

    @pl.when(k == 0)
    def _zero_acc():
        acc_ref[...] = jnp.zeros_like(acc_ref)

    # bf16 x bf16 -> f32 accumulation on the MXU.
    acc_ref[...] += jnp.dot(a_ref[...], w_ref[...],
                            preferred_element_type=jnp.float32)

    @pl.when(k == n_k - 1)
    def _epilogue():
        y = acc_ref[...] + bias_ref[...]
        if epilogue == "tanh":
            y = jnp.tanh(y)
        o_ref[...] = y.astype(o_ref.dtype)

        if want_stats:
            # Per-(batch, M-tile) partial sum / sumsq for a following
            # BatchNorm.  Padded rows (M padding) are masked out.  Partials
            # are reduced in the wrapper, so the M axis stays "parallel".
            rows = jax.lax.broadcasted_iota(jnp.int32, y.shape, 0) + i * tm
            ym = jnp.where(rows < m_real, y, 0.0)
            srow = jnp.sum(ym, axis=0, keepdims=True)       # (1, Np)
            ssq = jnp.sum(ym * ym, axis=0, keepdims=True)   # (1, Np)
            stats_ref[...] = jnp.concatenate([srow, ssq], axis=0)  # (2, Np)


def _xla_gemm(a, w, bias, *, epilogue, want_stats, out_dtype):
    """Small-M fallback: same math, plain XLA (launch-latency dominated)."""
    y = jax.lax.dot_general(a, w, (((2,), (1,)), ((0,), (0,))),
                            preferred_element_type=jnp.float32)
    y = y + bias.astype(jnp.float32)
    if epilogue == "tanh":
        y = jnp.tanh(y)
    out = y.astype(out_dtype)
    stats = None
    if want_stats:
        stats = (jnp.sum(y, axis=(0, 1)), jnp.sum(y * y, axis=(0, 1)))
    return out, stats


def fused_gemm_batched(a, w, bias, *, epilogue="none", want_stats=False,
                       out_dtype=jnp.bfloat16):
    """a: (B, M, K), w: (B, K, N), bias: (N,) f32 (shared across B).

    Returns (out[B, M, N] in out_dtype, stats) where stats is
    (per-channel sum, per-channel sumsq) over all B*M real rows (or None).
    """
    a = a.astype(jnp.bfloat16)
    w = w.astype(jnp.bfloat16)
    B, M, K = a.shape
    Bw, K2, N = w.shape
    assert Bw == B and K2 == K

    if M < _PALLAS_MIN_M:
        # Bottleneck 1x1 / 2x2 layers: bypass Pallas (review item).
        return _xla_gemm(a, w, bias, epilogue=epilogue,
                         want_stats=want_stats, out_dtype=out_dtype)

    # ---- tile / padding choices (lane-dense output, (8,128)-friendly blocks)
    if M >= 2048:
        TM = 1024
    elif M >= 512:
        TM = 512
    else:
        TM = _round_up(M, 8)
    Mp = _round_up(M, TM)
    Kp = _round_up(K, 128)
    Np = _round_up(N, 128)
    if Kp <= 512:
        TK = Kp
    elif Kp % 512 == 0:
        TK = 512
    elif Kp % 256 == 0:
        TK = 256
    else:
        TK = 128
    nm, nk = Mp // TM, Kp // TK

    a_p = a if (Mp, Kp) == (M, K) else jnp.pad(
        a, ((0, 0), (0, Mp - M), (0, Kp - K)))
    w_p = w if (Kp, Np) == (K, N) else jnp.pad(
        w, ((0, 0), (0, Kp - K), (0, Np - N)))
    b_p = bias if Np == N else jnp.pad(bias, (0, Np - N))
    b_p = b_p.reshape(1, Np).astype(jnp.float32)

    kernel = functools.partial(_fused_gemm_kernel, n_k=nk, epilogue=epilogue,
                               want_stats=want_stats, tm=TM, m_real=M)

    in_specs = [
        pl.BlockSpec((None, TM, TK), lambda b, i, k: (b, i, k)),
        pl.BlockSpec((None, TK, Np), lambda b, i, k: (b, k, 0)),
        pl.BlockSpec((1, Np), lambda b, i, k: (0, 0)),
    ]
    if want_stats:
        out_shape = (jax.ShapeDtypeStruct((B, Mp, Np), out_dtype),
                     jax.ShapeDtypeStruct((B, nm, 2, Np), jnp.float32))
        out_specs = (pl.BlockSpec((None, TM, Np), lambda b, i, k: (b, i, 0)),
                     pl.BlockSpec((None, None, 2, Np),
                                  lambda b, i, k: (b, i, 0, 0)))
    else:
        out_shape = jax.ShapeDtypeStruct((B, Mp, Np), out_dtype)
        out_specs = pl.BlockSpec((None, TM, Np), lambda b, i, k: (b, i, 0))

    # Right-sized VMEM limit from the actual double-buffered footprint.
    vmem_bytes = (2 * 2 * (TM * TK + TK * Np + TM * Np)   # double-buffered bf16
                  + 2 * 4 * (Np + 2 * Np)                 # bias + stats (f32)
                  + 4 * TM * Np)                          # f32 accumulator
    vmem_limit = int(min(48 * 1024 * 1024,
                         max(8 * 1024 * 1024, 2 * vmem_bytes + (4 << 20))))

    flops = 2 * B * Mp * Kp * Np
    bytes_accessed = 2 * B * (Mp * Kp + Kp * Np + Mp * Np) + 4 * Np
    if want_stats:
        bytes_accessed += 4 * B * nm * 2 * Np
    transcendentals = B * Mp * Np if epilogue == "tanh" else 0

    res = pl.pallas_call(
        kernel,
        out_shape=out_shape,
        grid=(B, nm, nk),
        in_specs=in_specs,
        out_specs=out_specs,
        scratch_shapes=[pltpu.VMEM((TM, Np), jnp.float32)],
        compiler_params=pltpu.CompilerParams(
            dimension_semantics=("parallel", "parallel", "arbitrary"),
            vmem_limit_bytes=vmem_limit),
        cost_estimate=pl.CostEstimate(flops=flops,
                                      transcendentals=transcendentals,
                                      bytes_accessed=bytes_accessed),
    )(a_p, w_p, b_p)

    if want_stats:
        out, st = res
        s = jnp.sum(st[:, :, 0, :N], axis=(0, 1))
        ss = jnp.sum(st[:, :, 1, :N], axis=(0, 1))
        return out[:, :M, :N], (s, ss)
    return res[:, :M, :N], None


# ----------------------------------------------------------------------------
# Lazy (deferred BatchNorm affine) feature maps, stored in bf16 NHWC
# ----------------------------------------------------------------------------

class Lazy(NamedTuple):
    data: jax.Array                 # (N, H, W, C) bf16, raw conv output
    scale: Optional[jax.Array]      # (C,) f32 pending BN scale, or None
    shift: Optional[jax.Array]      # (C,) f32 pending BN shift, or None


def _resolve(lz: Lazy, act: str):
    """Apply the pending per-channel affine and the pre-conv activation."""
    x = lz.data
    if lz.scale is not None:
        x = x.astype(jnp.float32) * lz.scale + lz.shift
    if act == "lrelu":
        x = jnp.where(x > 0, x, 0.2 * x)
    elif act == "relu":
        x = jnp.maximum(x, 0)
    return x.astype(jnp.bfloat16)


def _lazy_concat(a: Lazy, b: Lazy) -> Lazy:
    # TODO(synk): feed skip/up tensors as two A operands (split K grid axis)
    # instead of materializing the concat in HBM.
    ca, cb = a.data.shape[-1], b.data.shape[-1]
    sa = a.scale if a.scale is not None else jnp.ones((ca,), jnp.float32)
    ta = a.shift if a.shift is not None else jnp.zeros((ca,), jnp.float32)
    sb = b.scale if b.scale is not None else jnp.ones((cb,), jnp.float32)
    tb = b.shift if b.shift is not None else jnp.zeros((cb,), jnp.float32)
    return Lazy(jnp.concatenate([a.data, b.data], axis=-1),
                jnp.concatenate([sa, sb]), jnp.concatenate([ta, tb]))


def _bn_affine(stats, count, gamma, beta, eps=1e-5):
    """Training-mode BatchNorm2d (biased variance) as a per-channel affine."""
    total, total_sq = stats
    mean = total / count
    var = jnp.maximum(total_sq / count - mean * mean, 0.0)
    s = gamma * jax.lax.rsqrt(var + eps)
    t = beta - mean * s
    return s, t


# ----------------------------------------------------------------------------
# Conv / ConvTranspose built on the fused Pallas GEMM
# ----------------------------------------------------------------------------

def conv4x4_s2(lz, w, b, *, act, want_stats):
    """Conv2d(k=4, s=2, p=1). w: (4,4,Cin,Cout), b: (Cout,)."""
    # TODO(synk): replace the HBM im2col with an in-kernel tap-axis DMA over
    # parity planes of the padded input.
    x = _resolve(lz, act)                               # (N,H,W,Cin) bf16
    N, H, W, Cin = x.shape
    OH, OW = H // 2, W // 2
    Cout = w.shape[-1]
    xp = jnp.pad(x, ((0, 0), (1, 1), (1, 1), (0, 0)))
    patches = [xp[:, kh:kh + 2 * OH:2, kw:kw + 2 * OW:2, :]
               for kh in range(4) for kw in range(4)]
    a = jnp.stack(patches, axis=3).reshape(N * OH * OW, 16 * Cin)
    wm = w.reshape(16 * Cin, Cout).astype(jnp.bfloat16)
    out, stats = fused_gemm_batched(a[None], wm[None], b,
                                    want_stats=want_stats)
    return out[0].reshape(N, OH, OW, Cout), stats, N * OH * OW


def conv_transpose4x4_s2(lz, wt, b, *, act, epilogue="none", want_stats=False):
    """ConvTranspose2d(k=4, s=2, p=1), 4-phase sub-pixel decomposition fused
    into a single batched GEMM call (phase = leading grid axis).

    wt: (Cin, Cout, 4, 4) torch layout, b: (Cout,).
    """
    x = _resolve(lz, act)
    N, H, W, Cin = x.shape
    Cout = wt.shape[1]
    xp = jnp.pad(x, ((0, 0), (1, 1), (1, 1), (0, 0)))
    wt_bf = wt.astype(jnp.bfloat16)

    a_list, w_list = [], []
    for ph in range(2):
        for pw in range(2):
            pats, wrows = [], []
            for r in range(2):
                for s in range(2):
                    pats.append(xp[:, ph + r:ph + r + H, pw + s:pw + s + W, :])
                    wrows.append(wt_bf[:, :, 3 - 2 * r - ph, 3 - 2 * s - pw])
            a_list.append(jnp.stack(pats, axis=3).reshape(N * H * W, 4 * Cin))
            w_list.append(jnp.concatenate(wrows, axis=0))    # (4*Cin, Cout)
    a = jnp.stack(a_list, axis=0)                            # (4, M, 4*Cin)
    wm = jnp.stack(w_list, axis=0)                           # (4, 4*Cin, Cout)

    out, stats = fused_gemm_batched(a, wm, b, epilogue=epilogue,
                                    want_stats=want_stats)   # (4, M, Cout)

    # Interleave the 4 phases in one transpose+reshape:
    #   y[n, 2h+ph, 2w+pw, c] = out[ph*2+pw, n*H*W + h*W + w, c]
    y = out.reshape(2, 2, N, H, W, Cout).transpose(2, 3, 0, 4, 1, 5)
    y = y.reshape(N, 2 * H, 2 * W, Cout)
    return y, stats, 4 * N * H * W


# ----------------------------------------------------------------------------
# Parameter init (deterministic, synthetic) mirroring the PyTorch module
# ----------------------------------------------------------------------------

def _init_conv(key, cin, cout):
    k1, k2 = jax.random.split(key)
    return {"w": 0.05 * jax.random.normal(k1, (4, 4, cin, cout), jnp.float32),
            "b": 0.01 * jax.random.normal(k2, (cout,), jnp.float32)}


def _init_convT(key, cin, cout):
    k1, k2 = jax.random.split(key)
    return {"wt": 0.05 * jax.random.normal(k1, (cin, cout, 4, 4), jnp.float32),
            "b": 0.01 * jax.random.normal(k2, (cout,), jnp.float32)}


def _init_bn(c):
    return {"gamma": jnp.ones((c,), jnp.float32),
            "beta": jnp.zeros((c,), jnp.float32)}


def init_unet_block(key, outer_nc, inner_nc, submodule=None, outermost=False,
                    innermost=False, outermost_input_nc=-1):
    keys = jax.random.split(key, 2)
    down_in = outermost_input_nc if (outermost and outermost_input_nc > 0) else outer_nc
    p = {"outermost": outermost, "innermost": innermost,
         "downconv": _init_conv(keys[0], down_in, inner_nc),
         "submodule": submodule}
    if outermost:
        p["upconv"] = _init_convT(keys[1], inner_nc * 2, outer_nc)
    elif innermost:
        p["upconv"] = _init_convT(keys[1], inner_nc, outer_nc)
        p["upnorm"] = _init_bn(outer_nc)
    else:
        p["downnorm"] = _init_bn(inner_nc)
        p["upconv"] = _init_convT(keys[1], inner_nc * 2, outer_nc)
        p["upnorm"] = _init_bn(outer_nc)
    return p


def init_unet_generator(key, input_nc, output_nc, num_downs, ngf=8):
    keys = list(jax.random.split(key, num_downs))
    ki = iter(keys)
    block = init_unet_block(next(ki), ngf * 8, ngf * 8, innermost=True)
    for _ in range(num_downs - 5):
        block = init_unet_block(next(ki), ngf * 8, ngf * 8, submodule=block)
    block = init_unet_block(next(ki), ngf * 4, ngf * 8, submodule=block)
    block = init_unet_block(next(ki), ngf * 2, ngf * 4, submodule=block)
    block = init_unet_block(next(ki), ngf, ngf * 2, submodule=block)
    block = init_unet_block(next(ki), output_nc, ngf, submodule=block,
                            outermost=True, outermost_input_nc=input_nc)
    return block


# ----------------------------------------------------------------------------
# Forward pass (nn.Sequential ordering of the reference is preserved)
# ----------------------------------------------------------------------------

def unet_block_forward(p, lx: Lazy) -> Lazy:
    outermost, innermost = p["outermost"], p["innermost"]

    # ---- down path: [(lrelu), downconv, (downnorm)]
    down_act = "none" if outermost else "lrelu"
    down_bn = (not outermost) and (not innermost)
    d, dstats, dcount = conv4x4_s2(lx, p["downconv"]["w"], p["downconv"]["b"],
                                   act=down_act, want_stats=down_bn)
    if down_bn:
        s, t = _bn_affine(dstats, dcount,
                          p["downnorm"]["gamma"], p["downnorm"]["beta"])
        ly = Lazy(d, s, t)
    else:
        ly = Lazy(d, None, None)

    # ---- submodule
    if p["submodule"] is not None:
        ly = unet_block_forward(p["submodule"], ly)

    # ---- up path: [relu, upconv, (upnorm | tanh)]
    up_bn = not outermost
    epilogue = "tanh" if outermost else "none"
    u, ustats, ucount = conv_transpose4x4_s2(ly, p["upconv"]["wt"],
                                             p["upconv"]["b"], act="relu",
                                             epilogue=epilogue,
                                             want_stats=up_bn)
    if up_bn:
        s, t = _bn_affine(ustats, ucount,
                          p["upnorm"]["gamma"], p["upnorm"]["beta"])
        lu = Lazy(u, s, t)
    else:
        lu = Lazy(u, None, None)

    # ---- F.pad to match the skip spatial size (no-op for power-of-two inputs)
    dh = lx.data.shape[1] - lu.data.shape[1]
    dw = lx.data.shape[2] - lu.data.shape[2]
    if dh != 0 or dw != 0:
        data = _resolve(lu, "none")     # materialize pending BN before zero-pad
        data = jnp.pad(data, ((0, 0), (dh // 2, dh - dh // 2),
                              (dw // 2, dw - dw // 2), (0, 0)))
        lu = Lazy(data, None, None)

    if outermost:
        return lu
    return _lazy_concat(lu, lx)         # torch.cat([x1, x], dim=1) in NHWC


def unet_generator_forward(params, x_nchw):
    x = jnp.transpose(x_nchw, (0, 2, 3, 1)).astype(jnp.bfloat16)  # NCHW -> NHWC
    y = unet_block_forward(params, Lazy(x, None, None))
    out = _resolve(y, "none").astype(jnp.float32)
    return jnp.transpose(out, (0, 3, 1, 2))                        # NHWC -> NCHW


# ----------------------------------------------------------------------------
if __name__ == "__main__":
    key = jax.random.PRNGKey(0)
    kp, kx = jax.random.split(key)

    # Small but structurally faithful config: 5 down/up levels, ngf=8.
    # (num_downs=5 requires spatial >= 32 so the bottleneck reaches 1x1.)
    INPUT_NC, OUTPUT_NC, NUM_DOWNS, NGF = 3, 3, 5, 8
    params = init_unet_generator(kp, INPUT_NC, OUTPUT_NC, NUM_DOWNS, ngf=NGF)

    x = jax.random.normal(kx, (2, INPUT_NC, 32, 32), jnp.float32)  # NCHW like PyTorch

    fwd = jax.jit(lambda inp: unet_generator_forward(params, inp))
    out = jax.block_until_ready(fwd(x))

    assert out.shape == (2, OUTPUT_NC, 32, 32), out.shape
    assert bool(jnp.all(jnp.isfinite(out)))
    print("KERNEL_OK")
</pallas_src>

<mosaic_0001>
module attributes {stable_mosaic.version = 11 : i64} {
  func.func @_fused_gemm_kernel(%arg0: i32, %arg1: i32, %arg2: i32, %arg3: memref<1x512x128xbf16, #tpu.memory_space<vmem>>, %arg4: memref<1x128x128xbf16, #tpu.memory_space<vmem>>, %arg5: memref<1x128xf32, #tpu.memory_space<vmem>>, %arg6: memref<1x512x128xbf16, #tpu.memory_space<vmem>>, %arg7: memref<512x128xf32, #tpu.memory_space<vmem>>) attributes {dimension_semantics = [#tpu.dimension_semantics<parallel>, #tpu.dimension_semantics<parallel>, #tpu.dimension_semantics<arbitrary>], iteration_bounds = array<i64: 1, 1, 1>, scalar_prefetch = 0 : i64, scratch_operands = 1 : i64, tpu.core_type = #tpu.core_type<tc>, window_params = [{transform_indices = @transform_0, window_bounds = array<i64: 1, 512, 128>}, {transform_indices = @transform_1, window_bounds = array<i64: 1, 128, 128>}, {pipeline_mode = #tpu.pipeline_mode<synchronous>, transform_indices = @transform_2, window_bounds = array<i64: 1, 128>}, {transform_indices = @transform_3, window_bounds = array<i64: 1, 512, 128>}]} {
    %c0_i32 = arith.constant 0 : i32
    %0 = arith.cmpi eq, %arg2, %c0_i32 : i32
    %1 = arith.extui %0 : i1 to i32
    %c0_i32_0 = arith.constant 0 : i32
    %2 = arith.cmpi ne, %1, %c0_i32_0 : i32
    scf.if %2 {
      %cst_12 = arith.constant 0.000000e+00 : f32
      %14 = vector.broadcast %cst_12 : f32 to vector<512x128xf32>
      %c0_13 = arith.constant 0 : index
      %c0_14 = arith.constant 0 : index
      %15 = vector.load %arg7[%c0_13, %c0_14] : memref<512x128xf32, #tpu.memory_space<vmem>>, vector<512x128xf32>
      tpu.vector_store %arg7[%c0_13, %c0_14], %14 {strides = array<i32>} : memref<512x128xf32, #tpu.memory_space<vmem>>, vector<512x128xf32>,
    } else {
    }
    %c0 = arith.constant 0 : index
    %c0_1 = arith.constant 0 : index
    %3 = vector.load %arg7[%c0, %c0_1] : memref<512x128xf32, #tpu.memory_space<vmem>>, vector<512x128xf32>
    %c0_2 = arith.constant 0 : index
    %c0_3 = arith.constant 0 : index
    %c0_4 = arith.constant 0 : index
    %4 = vector.load %arg3[%c0_2, %c0_3, %c0_4] : memref<1x512x128xbf16, #tpu.memory_space<vmem>>, vector<1x512x128xbf16>
    %5 = vector.shape_cast %4 : vector<1x512x128xbf16> to vector<512x128xbf16>
    %c0_5 = arith.constant 0 : index
    %c0_6 = arith.constant 0 : index
    %c0_7 = arith.constant 0 : index
    %6 = vector.load %arg4[%c0_5, %c0_6, %c0_7] : memref<1x128x128xbf16, #tpu.memory_space<vmem>>, vector<1x128x128xbf16>
    %7 = vector.shape_cast %6 : vector<1x128x128xbf16> to vector<128x128xbf16>
    %cst = arith.constant dense<0.000000e+00> : vector<512x128xf32>
    %8 = tpu.matmul %5, %7, %cst {dimension_numbers = #tpu.dot_dimension_numbers<[1], [0], [0], [1], [0, 0, 1, 1], [], []>} : vector<512x128xbf16>, vector<128x128xbf16>, vector<512x128xf32> -> vector<512x128xf32>
    %9 = arith.addf %3, %8 : vector<512x128xf32>
    %c0_8 = arith.constant 0 : index
    %c0_9 = arith.constant 0 : index
    %10 = vector.load %arg7[%c0_8, %c0_9] : memref<512x128xf32, #tpu.memory_space<vmem>>, vector<512x128xf32>
    tpu.vector_store %arg7[%c0_8, %c0_9], %9 {strides = array<i32>} : memref<512x128xf32, #tpu.memory_space<vmem>>, vector<512x128xf32>,
    %c0_i32_10 = arith.constant 0 : i32
    %11 = arith.cmpi eq, %arg2, %c0_i32_10 : i32
    %12 = arith.extui %11 : i1 to i32
    %c0_i32_11 = arith.constant 0 : i32
    %13 = arith.cmpi ne, %12, %c0_i32_11 : i32
    scf.if %13 {
      %c0_12 = arith.constant 0 : index
      %c0_13 = arith.constant 0 : index
      %14 = vector.load %arg7[%c0_12, %c0_13] : memref<512x128xf32, #tpu.memory_space<vmem>>, vector<512x128xf32>
      %c0_14 = arith.constant 0 : index
      %c0_15 = arith.constant 0 : index
      %15 = vector.load %arg5[%c0_14, %c0_15] : memref<1x128xf32, #tpu.memory_space<vmem>>, vector<1x128xf32>
      %16 = vector.broadcast %15 : vector<1x128xf32> to vector<512x128xf32>
      %17 = arith.addf %14, %16 : vector<512x128xf32>
      %18 = arith.truncf %17 : vector<512x128xf32> to vector<512x128xbf16>
      %c0_16 = arith.constant 0 : index
      %c0_17 = arith.constant 0 : index
      %c0_18 = arith.constant 0 : index
      %19 = vector.load %arg6[%c0_16, %c0_17, %c0_18] : memref<1x512x128xbf16, #tpu.memory_space<vmem>>, vector<1x512x128xbf16>
      %20 = vector.shape_cast %19 : vector<1x512x128xbf16> to vector<512x128xbf16>
      %21 = vector.shape_cast %18 : vector<512x128xbf16> to vector<1x512x128xbf16>
      tpu.vector_store %arg6[%c0_16, %c0_17, %c0_18], %21 {strides = array<i32>} : memref<1x512x128xbf16, #tpu.memory_space<vmem>>, vector<1x512x128xbf16>,
    } else {
    }
    return
  }
  func.func @transform_0(%arg0: i32, %arg1: i32, %arg2: i32) -> (i32, i32, i32) {
    %c0_i32 = arith.constant 0 : i32
    return %arg0, %arg1, %arg2 : i32, i32, i32
  }
  func.func @transform_1(%arg0: i32, %arg1: i32, %arg2: i32) -> (i32, i32, i32) {
    %c0_i32 = arith.constant 0 : i32
    %c0_i32_0 = arith.constant 0 : i32
    return %arg0, %arg2, %c0_i32 : i32, i32, i32
  }
  func.func @transform_2(%arg0: i32, %arg1: i32, %arg2: i32) -> (i32, i32) {
    %c0_i32 = arith.constant 0 : i32
    %c0_i32_0 = arith.constant 0 : i32
    %c0_i32_1 = arith.constant 0 : i32
    return %c0_i32, %c0_i32_0 : i32, i32
  }
  func.func @transform_3(%arg0: i32, %arg1: i32, %arg2: i32) -> (i32, i32, i32) {
    %c0_i32 = arith.constant 0 : i32
    %c0_i32_0 = arith.constant 0 : i32
    return %arg0, %arg1, %c0_i32 : i32, i32, i32
  }
}

module attributes {stable_mosaic.version = 11 : i64} {
  func.func @_fused_gemm_kernel(%arg0: i32, %arg1: i32, %arg2: i32, %arg3: memref<1x128x128xbf16, #tpu.memory_space<vmem>>, %arg4: memref<1x128x128xbf16, #tpu.memory_space<vmem>>, %arg5: memref<1x128xf32, #tpu.memory_space<vmem>>, %arg6: memref<1x128x128xbf16, #tpu.memory_space<vmem>>, %arg7: memref<1x1x2x128xf32, #tpu.memory_space<vmem>>, %arg8: memref<128x128xf32, #tpu.memory_space<vmem>>) attributes {dimension_semantics = [#tpu.dimension_semantics<parallel>, #tpu.dimension_semantics<parallel>, #tpu.dimension_semantics<arbitrary>], iteration_bounds = array<i64: 1, 1, 1>, scalar_prefetch = 0 : i64, scratch_operands = 1 : i64, tpu.core_type = #tpu.core_type<tc>, window_params = [{transform_indices = @transform_0, window_bounds = array<i64: 1, 128, 128>}, {transform_indices = @transform_1, window_bounds = array<i64: 1, 128, 128>}, {pipeline_mode = #tpu.pipeline_mode<synchronous>, transform_indices = @transform_2, window_bounds = array<i64: 1, 128>}, {transform_indices = @transform_3, window_bounds = array<i64: 1, 128, 128>}, {transform_indices = @transform_4, window_bounds = array<i64: 1, 1, 2, 128>}]} {
    %c0_i32 = arith.constant 0 : i32
    %0 = arith.cmpi eq, %arg2, %c0_i32 : i32
    %1 = arith.extui %0 : i1 to i32
    %c0_i32_0 = arith.constant 0 : i32
    %2 = arith.cmpi ne, %1, %c0_i32_0 : i32
    scf.if %2 {
      %cst_12 = arith.constant 0.000000e+00 : f32
      %14 = vector.broadcast %cst_12 : f32 to vector<128x128xf32>
      %c0_13 = arith.constant 0 : index
      %c0_14 = arith.constant 0 : index
      %15 = vector.load %arg8[%c0_13, %c0_14] : memref<128x128xf32, #tpu.memory_space<vmem>>, vector<128x128xf32>
      tpu.vector_store %arg8[%c0_13, %c0_14], %14 {strides = array<i32>} : memref<128x128xf32, #tpu.memory_space<vmem>>, vector<128x128xf32>,
    } else {
    }
    %c0 = arith.constant 0 : index
    %c0_1 = arith.constant 0 : index
    %3 = vector.load %arg8[%c0, %c0_1] : memref<128x128xf32, #tpu.memory_space<vmem>>, vector<128x128xf32>
    %c0_2 = arith.constant 0 : index
    %c0_3 = arith.constant 0 : index
    %c0_4 = arith.constant 0 : index
    %4 = vector.load %arg3[%c0_2, %c0_3, %c0_4] : memref<1x128x128xbf16, #tpu.memory_space<vmem>>, vector<1x128x128xbf16>
    %5 = vector.shape_cast %4 : vector<1x128x128xbf16> to vector<128x128xbf16>
    %c0_5 = arith.constant 0 : index
    %c0_6 = arith.constant 0 : index
    %c0_7 = arith.constant 0 : index
    %6 = vector.load %arg4[%c0_5, %c0_6, %c0_7] : memref<1x128x128xbf16, #tpu.memory_space<vmem>>, vector<1x128x128xbf16>
    %7 = vector.shape_cast %6 : vector<1x128x128xbf16> to vector<128x128xbf16>
    %cst = arith.constant dense<0.000000e+00> : vector<128x128xf32>
    %8 = tpu.matmul %5, %7, %cst {dimension_numbers = #tpu.dot_dimension_numbers<[1], [0], [0], [1], [0, 0, 1, 1], [], []>} : vector<128x128xbf16>, vector<128x128xbf16>, vector<128x128xf32> -> vector<128x128xf32>
    %9 = arith.addf %3, %8 : vector<128x128xf32>
    %c0_8 = arith.constant 0 : index
    %c0_9 = arith.constant 0 : index
    %10 = vector.load %arg8[%c0_8, %c0_9] : memref<128x128xf32, #tpu.memory_space<vmem>>, vector<128x128xf32>
    tpu.vector_store %arg8[%c0_8, %c0_9], %9 {strides = array<i32>} : memref<128x128xf32, #tpu.memory_space<vmem>>, vector<128x128xf32>,
    %c0_i32_10 = arith.constant 0 : i32
    %11 = arith.cmpi eq, %arg2, %c0_i32_10 : i32
    %12 = arith.extui %11 : i1 to i32
    %c0_i32_11 = arith.constant 0 : i32
    %13 = arith.cmpi ne, %12, %c0_i32_11 : i32
    scf.if %13 {
      %c0_12 = arith.constant 0 : index
      %c0_13 = arith.constant 0 : index
      %14 = vector.load %arg8[%c0_12, %c0_13] : memref<128x128xf32, #tpu.memory_space<vmem>>, vector<128x128xf32>
      %c0_14 = arith.constant 0 : index
      %c0_15 = arith.constant 0 : index
      %15 = vector.load %arg5[%c0_14, %c0_15] : memref<1x128xf32, #tpu.memory_space<vmem>>, vector<1x128xf32>
      %16 = vector.broadcast %15 : vector<1x128xf32> to vector<128x128xf32>
      %17 = arith.addf %14, %16 : vector<128x128xf32>
      %18 = arith.truncf %17 : vector<128x128xf32> to vector<128x128xbf16>
      %c0_16 = arith.constant 0 : index
      %c0_17 = arith.constant 0 : index
      %c0_18 = arith.constant 0 : index
      %19 = vector.load %arg6[%c0_16, %c0_17, %c0_18] : memref<1x128x128xbf16, #tpu.memory_space<vmem>>, vector<1x128x128xbf16>
      %20 = vector.shape_cast %19 : vector<1x128x128xbf16> to vector<128x128xbf16>
      %21 = vector.shape_cast %18 : vector<128x128xbf16> to vector<1x128x128xbf16>
      tpu.vector_store %arg6[%c0_16, %c0_17, %c0_18], %21 {strides = array<i32>} : memref<1x128x128xbf16, #tpu.memory_space<vmem>>, vector<1x128x128xbf16>,
      %22 = tpu.iota {dimensions = array<i32: 0>} : vector<128x128xi32>
      %c128_i32 = arith.constant 128 : i32
      %23 = arith.muli %arg1, %c128_i32 : i32
      %24 = vector.broadcast %23 : i32 to vector<128x128xi32>
      %25 = arith.addi %22, %24 : vector<128x128xi32>
      %c128_i32_19 = arith.constant 128 : i32
      %26 = vector.broadcast %c128_i32_19 : i32 to vector<128x128xi32>
      %27 = arith.cmpi slt, %25, %26 : vector<128x128xi32>
      %cst_20 = arith.constant 0.000000e+00 : f32
      %28 = vector.broadcast %cst_20 : f32 to vector<128x128xf32>
      %29 = arith.select %27, %17, %28 : vector<128x128xi1>, vector<128x128xf32>
      %cst_21 = arith.constant dense<0.000000e+00> : vector<128xf32>
      %30 = vector.multi_reduction <add>, %29, %cst_21 [0] : vector<128x128xf32> to vector<128xf32>
      %31 = vector.shape_cast %30 : vector<128xf32> to vector<1x128xf32>
      %32 = arith.mulf %29, %29 : vector<128x128xf32>
      %cst_22 = arith.constant dense<0.000000e+00> : vector<128xf32>
      %33 = vector.multi_reduction <add>, %32, %cst_22 [0] : vector<128x128xf32> to vector<128xf32>
      %34 = vector.shape_cast %33 : vector<128xf32> to vector<1x128xf32>
      %35 = tpu.concatenate %31, %34 in 0 : vector<1x128xf32>, vector<1x128xf32> -> vector<2x128xf32>
      %c0_23 = arith.constant 0 : index
      %c0_24 = arith.constant 0 : index
      %c0_25 = arith.constant 0 : index
      %c0_26 = arith.constant 0 : index
      %36 = vector.load %arg7[%c0_23, %c0_24, %c0_25, %c0_26] : memref<1x1x2x128xf32, #tpu.memory_space<vmem>>, vector<1x1x2x128xf32>
      %37 = vector.shape_cast %36 : vector<1x1x2x128xf32> to vector<2x128xf32>
      %38 = vector.shape_cast %35 : vector<2x128xf32> to vector<1x1x2x128xf32>
      tpu.vector_store %arg7[%c0_23, %c0_24, %c0_25, %c0_26], %38 {strides = array<i32>} : memref<1x1x2x128xf32, #tpu.memory_space<vmem>>, vector<1x1x2x128xf32>,
    } else {
    }
    return
  }
  func.func @transform_0(%arg0: i32, %arg1: i32, %arg2: i32) -> (i32, i32, i32) {
    %c0_i32 = arith.constant 0 : i32
    return %arg0, %arg1, %arg2 : i32, i32, i32
  }
  func.func @transform_1(%arg0: i32, %arg1: i32, %arg2: i32) -> (i32, i32, i32) {
    %c0_i32 = arith.constant 0 : i32
    %c0_i32_0 = arith.constant 0 : i32
    return %arg0, %arg2, %c0_i32 : i32, i32, i32
  }
  func.func @transform_2(%arg0: i32, %arg1: i32, %arg2: i32) -> (i32, i32) {
    %c0_i32 = arith.constant 0 : i32
    %c0_i32_0 = arith.constant 0 : i32
    %c0_i32_1 = arith.constant 0 : i32
    return %c0_i32, %c0_i32_0 : i32, i32
  }
  func.func @transform_3(%arg0: i32, %arg1: i32, %arg2: i32) -> (i32, i32, i32) {
    %c0_i32 = arith.constant 0 : i32
    %c0_i32_0 = arith.constant 0 : i32
    return %arg0, %arg1, %c0_i32 : i32, i32, i32
  }
  func.func @transform_4(%arg0: i32, %arg1: i32, %arg2: i32) -> (i32, i32, i32, i32) {
    %c0_i32 = arith.constant 0 : i32
    %c0_i32_0 = arith.constant 0 : i32
    %c0_i32_1 = arith.constant 0 : i32
    return %arg0, %arg1, %c0_i32, %c0_i32_0 : i32, i32, i32, i32
  }
}

module attributes {stable_mosaic.version = 11 : i64} {
  func.func @_fused_gemm_kernel(%arg0: i32, %arg1: i32, %arg2: i32, %arg3: memref<1x32x256xbf16, #tpu.memory_space<vmem>>, %arg4: memref<1x256x128xbf16, #tpu.memory_space<vmem>>, %arg5: memref<1x128xf32, #tpu.memory_space<vmem>>, %arg6: memref<1x32x128xbf16, #tpu.memory_space<vmem>>, %arg7: memref<1x1x2x128xf32, #tpu.memory_space<vmem>>, %arg8: memref<32x128xf32, #tpu.memory_space<vmem>>) attributes {dimension_semantics = [#tpu.dimension_semantics<parallel>, #tpu.dimension_semantics<parallel>, #tpu.dimension_semantics<arbitrary>], iteration_bounds = array<i64: 1, 1, 1>, scalar_prefetch = 0 : i64, scratch_operands = 1 : i64, tpu.core_type = #tpu.core_type<tc>, window_params = [{transform_indices = @transform_0, window_bounds = array<i64: 1, 32, 256>}, {transform_indices = @transform_1, window_bounds = array<i64: 1, 256, 128>}, {pipeline_mode = #tpu.pipeline_mode<synchronous>, transform_indices = @transform_2, window_bounds = array<i64: 1, 128>}, {transform_indices = @transform_3, window_bounds = array<i64: 1, 32, 128>}, {transform_indices = @transform_4, window_bounds = array<i64: 1, 1, 2, 128>}]} {
    %c0_i32 = arith.constant 0 : i32
    %0 = arith.cmpi eq, %arg2, %c0_i32 : i32
    %1 = arith.extui %0 : i1 to i32
    %c0_i32_0 = arith.constant 0 : i32
    %2 = arith.cmpi ne, %1, %c0_i32_0 : i32
    scf.if %2 {
      %cst_12 = arith.constant 0.000000e+00 : f32
      %14 = vector.broadcast %cst_12 : f32 to vector<32x128xf32>
      %c0_13 = arith.constant 0 : index
      %c0_14 = arith.constant 0 : index
      %15 = vector.load %arg8[%c0_13, %c0_14] : memref<32x128xf32, #tpu.memory_space<vmem>>, vector<32x128xf32>
      tpu.vector_store %arg8[%c0_13, %c0_14], %14 {strides = array<i32>} : memref<32x128xf32, #tpu.memory_space<vmem>>, vector<32x128xf32>,
    } else {
    }
    %c0 = arith.constant 0 : index
    %c0_1 = arith.constant 0 : index
    %3 = vector.load %arg8[%c0, %c0_1] : memref<32x128xf32, #tpu.memory_space<vmem>>, vector<32x128xf32>
    %c0_2 = arith.constant 0 : index
    %c0_3 = arith.constant 0 : index
    %c0_4 = arith.constant 0 : index
    %4 = vector.load %arg3[%c0_2, %c0_3, %c0_4] : memref<1x32x256xbf16, #tpu.memory_space<vmem>>, vector<1x32x256xbf16>
    %5 = vector.shape_cast %4 : vector<1x32x256xbf16> to vector<32x256xbf16>
    %c0_5 = arith.constant 0 : index
    %c0_6 = arith.constant 0 : index
    %c0_7 = arith.constant 0 : index
    %6 = vector.load %arg4[%c0_5, %c0_6, %c0_7] : memref<1x256x128xbf16, #tpu.memory_space<vmem>>, vector<1x256x128xbf16>
    %7 = vector.shape_cast %6 : vector<1x256x128xbf16> to vector<256x128xbf16>
    %cst = arith.constant dense<0.000000e+00> : vector<32x128xf32>
    %8 = tpu.matmul %5, %7, %cst {dimension_numbers = #tpu.dot_dimension_numbers<[1], [0], [0], [1], [0, 0, 1, 1], [], []>} : vector<32x256xbf16>, vector<256x128xbf16>, vector<32x128xf32> -> vector<32x128xf32>
    %9 = arith.addf %3, %8 : vector<32x128xf32>
    %c0_8 = arith.constant 0 : index
    %c0_9 = arith.constant 0 : index
    %10 = vector.load %arg8[%c0_8, %c0_9] : memref<32x128xf32, #tpu.memory_space<vmem>>, vector<32x128xf32>
    tpu.vector_store %arg8[%c0_8, %c0_9], %9 {strides = array<i32>} : memref<32x128xf32, #tpu.memory_space<vmem>>, vector<32x128xf32>,
    %c0_i32_10 = arith.constant 0 : i32
    %11 = arith.cmpi eq, %arg2, %c0_i32_10 : i32
    %12 = arith.extui %11 : i1 to i32
    %c0_i32_11 = arith.constant 0 : i32
    %13 = arith.cmpi ne, %12, %c0_i32_11 : i32
    scf.if %13 {
      %c0_12 = arith.constant 0 : index
      %c0_13 = arith.constant 0 : index
      %14 = vector.load %arg8[%c0_12, %c0_13] : memref<32x128xf32, #tpu.memory_space<vmem>>, vector<32x128xf32>
      %c0_14 = arith.constant 0 : index
      %c0_15 = arith.constant 0 : index
      %15 = vector.load %arg5[%c0_14, %c0_15] : memref<1x128xf32, #tpu.memory_space<vmem>>, vector<1x128xf32>
      %16 = vector.broadcast %15 : vector<1x128xf32> to vector<32x128xf32>
      %17 = arith.addf %14, %16 : vector<32x128xf32>
      %18 = arith.truncf %17 : vector<32x128xf32> to vector<32x128xbf16>
      %c0_16 = arith.constant 0 : index
      %c0_17 = arith.constant 0 : index
      %c0_18 = arith.constant 0 : index
      %19 = vector.load %arg6[%c0_16, %c0_17, %c0_18] : memref<1x32x128xbf16, #tpu.memory_space<vmem>>, vector<1x32x128xbf16>
      %20 = vector.shape_cast %19 : vector<1x32x128xbf16> to vector<32x128xbf16>
      %21 = vector.shape_cast %18 : vector<32x128xbf16> to vector<1x32x128xbf16>
      tpu.vector_store %arg6[%c0_16, %c0_17, %c0_18], %21 {strides = array<i32>} : memref<1x32x128xbf16, #tpu.memory_space<vmem>>, vector<1x32x128xbf16>,
      %22 = tpu.iota {dimensions = array<i32: 0>} : vector<32x128xi32>
      %c32_i32 = arith.constant 32 : i32
      %23 = arith.muli %arg1, %c32_i32 : i32
      %24 = vector.broadcast %23 : i32 to vector<32x128xi32>
      %25 = arith.addi %22, %24 : vector<32x128xi32>
      %c32_i32_19 = arith.constant 32 : i32
      %26 = vector.broadcast %c32_i32_19 : i32 to vector<32x128xi32>
      %27 = arith.cmpi slt, %25, %26 : vector<32x128xi32>
      %cst_20 = arith.constant 0.000000e+00 : f32
      %28 = vector.broadcast %cst_20 : f32 to vector<32x128xf32>
      %29 = arith.select %27, %17, %28 : vector<32x128xi1>, vector<32x128xf32>
      %cst_21 = arith.constant dense<0.000000e+00> : vector<128xf32>
      %30 = vector.multi_reduction <add>, %29, %cst_21 [0] : vector<32x128xf32> to vector<128xf32>
      %31 = vector.shape_cast %30 : vector<128xf32> to vector<1x128xf32>
      %32 = arith.mulf %29, %29 : vector<32x128xf32>
      %cst_22 = arith.constant dense<0.000000e+00> : vector<128xf32>
      %33 = vector.multi_reduction <add>, %32, %cst_22 [0] : vector<32x128xf32> to vector<128xf32>
      %34 = vector.shape_cast %33 : vector<128xf32> to vector<1x128xf32>
      %35 = tpu.concatenate %31, %34 in 0 : vector<1x128xf32>, vector<1x128xf32> -> vector<2x128xf32>
      %c0_23 = arith.constant 0 : index
      %c0_24 = arith.constant 0 : index
      %c0_25 = arith.constant 0 : index
      %c0_26 = arith.constant 0 : index
      %36 = vector.load %arg7[%c0_23, %c0_24, %c0_25, %c0_26] : memref<1x1x2x128xf32, #tpu.memory_space<vmem>>, vector<1x1x2x128xf32>
      %37 = vector.shape_cast %36 : vector<1x1x2x128xf32> to vector<2x128xf32>
      %38 = vector.shape_cast %35 : vector<2x128xf32> to vector<1x1x2x128xf32>
      tpu.vector_store %arg7[%c0_23, %c0_24, %c0_25, %c0_26], %38 {strides = array<i32>} : memref<1x1x2x128xf32, #tpu.memory_space<vmem>>, vector<1x1x2x128xf32>,
    } else {
    }
    return
  }
  func.func @transform_0(%arg0: i32, %arg1: i32, %arg2: i32) -> (i32, i32, i32) {
    %c0_i32 = arith.constant 0 : i32
    return %arg0, %arg1, %arg2 : i32, i32, i32
  }
  func.func @transform_1(%arg0: i32, %arg1: i32, %arg2: i32) -> (i32, i32, i32) {
    %c0_i32 = arith.constant 0 : i32
    %c0_i32_0 = arith.constant 0 : i32
    return %arg0, %arg2, %c0_i32 : i32, i32, i32
  }
  func.func @transform_2(%arg0: i32, %arg1: i32, %arg2: i32) -> (i32, i32) {
    %c0_i32 = arith.constant 0 : i32
    %c0_i32_0 = arith.constant 0 : i32
    %c0_i32_1 = arith.constant 0 : i32
    return %c0_i32, %c0_i32_0 : i32, i32
  }
  func.func @transform_3(%arg0: i32, %arg1: i32, %arg2: i32) -> (i32, i32, i32) {
    %c0_i32 = arith.constant 0 : i32
    %c0_i32_0 = arith.constant 0 : i32
    return %arg0, %arg1, %c0_i32 : i32, i32, i32
  }
  func.func @transform_4(%arg0: i32, %arg1: i32, %arg2: i32) -> (i32, i32, i32, i32) {
    %c0_i32 = arith.constant 0 : i32
    %c0_i32_0 = arith.constant 0 : i32
    %c0_i32_1 = arith.constant 0 : i32
    return %arg0, %arg1, %c0_i32, %c0_i32_0 : i32, i32, i32, i32
  }
}

module attributes {stable_mosaic.version = 11 : i64} {
  func.func @_fused_gemm_kernel(%arg0: i32, %arg1: i32, %arg2: i32, %arg3: memref<1x32x256xbf16, #tpu.memory_space<vmem>>, %arg4: memref<1x256x128xbf16, #tpu.memory_space<vmem>>, %arg5: memref<1x128xf32, #tpu.memory_space<vmem>>, %arg6: memref<1x32x128xbf16, #tpu.memory_space<vmem>>, %arg7: memref<1x1x2x128xf32, #tpu.memory_space<vmem>>, %arg8: memref<32x128xf32, #tpu.memory_space<vmem>>) attributes {dimension_semantics = [#tpu.dimension_semantics<parallel>, #tpu.dimension_semantics<parallel>, #tpu.dimension_semantics<arbitrary>], iteration_bounds = array<i64: 4, 1, 1>, scalar_prefetch = 0 : i64, scratch_operands = 1 : i64, tpu.core_type = #tpu.core_type<tc>, window_params = [{transform_indices = @transform_0, window_bounds = array<i64: 1, 32, 256>}, {transform_indices = @transform_1, window_bounds = array<i64: 1, 256, 128>}, {pipeline_mode = #tpu.pipeline_mode<synchronous>, transform_indices = @transform_2, window_bounds = array<i64: 1, 128>}, {transform_indices = @transform_3, window_bounds = array<i64: 1, 32, 128>}, {transform_indices = @transform_4, window_bounds = array<i64: 1, 1, 2, 128>}]} {
    %c0_i32 = arith.constant 0 : i32
    %0 = arith.cmpi eq, %arg2, %c0_i32 : i32
    %1 = arith.extui %0 : i1 to i32
    %c0_i32_0 = arith.constant 0 : i32
    %2 = arith.cmpi ne, %1, %c0_i32_0 : i32
    scf.if %2 {
      %cst_12 = arith.constant 0.000000e+00 : f32
      %14 = vector.broadcast %cst_12 : f32 to vector<32x128xf32>
      %c0_13 = arith.constant 0 : index
      %c0_14 = arith.constant 0 : index
      %15 = vector.load %arg8[%c0_13, %c0_14] : memref<32x128xf32, #tpu.memory_space<vmem>>, vector<32x128xf32>
      tpu.vector_store %arg8[%c0_13, %c0_14], %14 {strides = array<i32>} : memref<32x128xf32, #tpu.memory_space<vmem>>, vector<32x128xf32>,
    } else {
    }
    %c0 = arith.constant 0 : index
    %c0_1 = arith.constant 0 : index
    %3 = vector.load %arg8[%c0, %c0_1] : memref<32x128xf32, #tpu.memory_space<vmem>>, vector<32x128xf32>
    %c0_2 = arith.constant 0 : index
    %c0_3 = arith.constant 0 : index
    %c0_4 = arith.constant 0 : index
    %4 = vector.load %arg3[%c0_2, %c0_3, %c0_4] : memref<1x32x256xbf16, #tpu.memory_space<vmem>>, vector<1x32x256xbf16>
    %5 = vector.shape_cast %4 : vector<1x32x256xbf16> to vector<32x256xbf16>
    %c0_5 = arith.constant 0 : index
    %c0_6 = arith.constant 0 : index
    %c0_7 = arith.constant 0 : index
    %6 = vector.load %arg4[%c0_5, %c0_6, %c0_7] : memref<1x256x128xbf16, #tpu.memory_space<vmem>>, vector<1x256x128xbf16>
    %7 = vector.shape_cast %6 : vector<1x256x128xbf16> to vector<256x128xbf16>
    %cst = arith.constant dense<0.000000e+00> : vector<32x128xf32>
    %8 = tpu.matmul %5, %7, %cst {dimension_numbers = #tpu.dot_dimension_numbers<[1], [0], [0], [1], [0, 0, 1, 1], [], []>} : vector<32x256xbf16>, vector<256x128xbf16>, vector<32x128xf32> -> vector<32x128xf32>
    %9 = arith.addf %3, %8 : vector<32x128xf32>
    %c0_8 = arith.constant 0 : index
    %c0_9 = arith.constant 0 : index
    %10 = vector.load %arg8[%c0_8, %c0_9] : memref<32x128xf32, #tpu.memory_space<vmem>>, vector<32x128xf32>
    tpu.vector_store %arg8[%c0_8, %c0_9], %9 {strides = array<i32>} : memref<32x128xf32, #tpu.memory_space<vmem>>, vector<32x128xf32>,
    %c0_i32_10 = arith.constant 0 : i32
    %11 = arith.cmpi eq, %arg2, %c0_i32_10 : i32
    %12 = arith.extui %11 : i1 to i32
    %c0_i32_11 = arith.constant 0 : i32
    %13 = arith.cmpi ne, %12, %c0_i32_11 : i32
    scf.if %13 {
      %c0_12 = arith.constant 0 : index
      %c0_13 = arith.constant 0 : index
      %14 = vector.load %arg8[%c0_12, %c0_13] : memref<32x128xf32, #tpu.memory_space<vmem>>, vector<32x128xf32>
      %c0_14 = arith.constant 0 : index
      %c0_15 = arith.constant 0 : index
      %15 = vector.load %arg5[%c0_14, %c0_15] : memref<1x128xf32, #tpu.memory_space<vmem>>, vector<1x128xf32>
      %16 = vector.broadcast %15 : vector<1x128xf32> to vector<32x128xf32>
      %17 = arith.addf %14, %16 : vector<32x128xf32>
      %18 = arith.truncf %17 : vector<32x128xf32> to vector<32x128xbf16>
      %c0_16 = arith.constant 0 : index
      %c0_17 = arith.constant 0 : index
      %c0_18 = arith.constant 0 : index
      %19 = vector.load %arg6[%c0_16, %c0_17, %c0_18] : memref<1x32x128xbf16, #tpu.memory_space<vmem>>, vector<1x32x128xbf16>
      %20 = vector.shape_cast %19 : vector<1x32x128xbf16> to vector<32x128xbf16>
      %21 = vector.shape_cast %18 : vector<32x128xbf16> to vector<1x32x128xbf16>
      tpu.vector_store %arg6[%c0_16, %c0_17, %c0_18], %21 {strides = array<i32>} : memref<1x32x128xbf16, #tpu.memory_space<vmem>>, vector<1x32x128xbf16>,
      %22 = tpu.iota {dimensions = array<i32: 0>} : vector<32x128xi32>
      %c32_i32 = arith.constant 32 : i32
      %23 = arith.muli %arg1, %c32_i32 : i32
      %24 = vector.broadcast %23 : i32 to vector<32x128xi32>
      %25 = arith.addi %22, %24 : vector<32x128xi32>
      %c32_i32_19 = arith.constant 32 : i32
      %26 = vector.broadcast %c32_i32_19 : i32 to vector<32x128xi32>
      %27 = arith.cmpi slt, %25, %26 : vector<32x128xi32>
      %cst_20 = arith.constant 0.000000e+00 : f32
      %28 = vector.broadcast %cst_20 : f32 to vector<32x128xf32>
      %29 = arith.select %27, %17, %28 : vector<32x128xi1>, vector<32x128xf32>
      %cst_21 = arith.constant dense<0.000000e+00> : vector<128xf32>
      %30 = vector.multi_reduction <add>, %29, %cst_21 [0] : vector<32x128xf32> to vector<128xf32>
      %31 = vector.shape_cast %30 : vector<128xf32> to vector<1x128xf32>
      %32 = arith.mulf %29, %29 : vector<32x128xf32>
      %cst_22 = arith.constant dense<0.000000e+00> : vector<128xf32>
      %33 = vector.multi_reduction <add>, %32, %cst_22 [0] : vector<32x128xf32> to vector<128xf32>
      %34 = vector.shape_cast %33 : vector<128xf32> to vector<1x128xf32>
      %35 = tpu.concatenate %31, %34 in 0 : vector<1x128xf32>, vector<1x128xf32> -> vector<2x128xf32>
      %c0_23 = arith.constant 0 : index
      %c0_24 = arith.constant 0 : index
      %c0_25 = arith.constant 0 : index
      %c0_26 = arith.constant 0 : index
      %36 = vector.load %arg7[%c0_23, %c0_24, %c0_25, %c0_26] : memref<1x1x2x128xf32, #tpu.memory_space<vmem>>, vector<1x1x2x128xf32>
      %37 = vector.shape_cast %36 : vector<1x1x2x128xf32> to vector<2x128xf32>
      %38 = vector.shape_cast %35 : vector<2x128xf32> to vector<1x1x2x128xf32>
      tpu.vector_store %arg7[%c0_23, %c0_24, %c0_25, %c0_26], %38 {strides = array<i32>} : memref<1x1x2x128xf32, #tpu.memory_space<vmem>>, vector<1x1x2x128xf32>,
    } else {
    }
    return
  }
  func.func @transform_0(%arg0: i32, %arg1: i32, %arg2: i32) -> (i32, i32, i32) {
    %c0_i32 = arith.constant 0 : i32
    return %arg0, %arg1, %arg2 : i32, i32, i32
  }
  func.func @transform_1(%arg0: i32, %arg1: i32, %arg2: i32) -> (i32, i32, i32) {
    %c0_i32 = arith.constant 0 : i32
    %c0_i32_0 = arith.constant 0 : i32
    return %arg0, %arg2, %c0_i32 : i32, i32, i32
  }
  func.func @transform_2(%arg0: i32, %arg1: i32, %arg2: i32) -> (i32, i32) {
    %c0_i32 = arith.constant 0 : i32
    %c0_i32_0 = arith.constant 0 : i32
    %c0_i32_1 = arith.constant 0 : i32
    return %c0_i32, %c0_i32_0 : i32, i32
  }
  func.func @transform_3(%arg0: i32, %arg1: i32, %arg2: i32) -> (i32, i32, i32) {
    %c0_i32 = arith.constant 0 : i32
    %c0_i32_0 = arith.constant 0 : i32
    return %arg0, %arg1, %c0_i32 : i32, i32, i32
  }
  func.func @transform_4(%arg0: i32, %arg1: i32, %arg2: i32) -> (i32, i32, i32, i32) {
    %c0_i32 = arith.constant 0 : i32
    %c0_i32_0 = arith.constant 0 : i32
    %c0_i32_1 = arith.constant 0 : i32
    return %arg0, %arg1, %c0_i32, %c0_i32_0 : i32, i32, i32, i32
  }
}

module attributes {stable_mosaic.version = 11 : i64} {
  func.func @_fused_gemm_kernel(%arg0: i32, %arg1: i32, %arg2: i32, %arg3: memref<1x128x128xbf16, #tpu.memory_space<vmem>>, %arg4: memref<1x128x128xbf16, #tpu.memory_space<vmem>>, %arg5: memref<1x128xf32, #tpu.memory_space<vmem>>, %arg6: memref<1x128x128xbf16, #tpu.memory_space<vmem>>, %arg7: memref<1x1x2x128xf32, #tpu.memory_space<vmem>>, %arg8: memref<128x128xf32, #tpu.memory_space<vmem>>) attributes {dimension_semantics = [#tpu.dimension_semantics<parallel>, #tpu.dimension_semantics<parallel>, #tpu.dimension_semantics<arbitrary>], iteration_bounds = array<i64: 4, 1, 1>, scalar_prefetch = 0 : i64, scratch_operands = 1 : i64, tpu.core_type = #tpu.core_type<tc>, window_params = [{transform_indices = @transform_0, window_bounds = array<i64: 1, 128, 128>}, {transform_indices = @transform_1, window_bounds = array<i64: 1, 128, 128>}, {pipeline_mode = #tpu.pipeline_mode<synchronous>, transform_indices = @transform_2, window_bounds = array<i64: 1, 128>}, {transform_indices = @transform_3, window_bounds = array<i64: 1, 128, 128>}, {transform_indices = @transform_4, window_bounds = array<i64: 1, 1, 2, 128>}]} {
    %c0_i32 = arith.constant 0 : i32
    %0 = arith.cmpi eq, %arg2, %c0_i32 : i32
    %1 = arith.extui %0 : i1 to i32
    %c0_i32_0 = arith.constant 0 : i32
    %2 = arith.cmpi ne, %1, %c0_i32_0 : i32
    scf.if %2 {
      %cst_12 = arith.constant 0.000000e+00 : f32
      %14 = vector.broadcast %cst_12 : f32 to vector<128x128xf32>
      %c0_13 = arith.constant 0 : index
      %c0_14 = arith.constant 0 : index
      %15 = vector.load %arg8[%c0_13, %c0_14] : memref<128x128xf32, #tpu.memory_space<vmem>>, vector<128x128xf32>
      tpu.vector_store %arg8[%c0_13, %c0_14], %14 {strides = array<i32>} : memref<128x128xf32, #tpu.memory_space<vmem>>, vector<128x128xf32>,
    } else {
    }
    %c0 = arith.constant 0 : index
    %c0_1 = arith.constant 0 : index
    %3 = vector.load %arg8[%c0, %c0_1] : memref<128x128xf32, #tpu.memory_space<vmem>>, vector<128x128xf32>
    %c0_2 = arith.constant 0 : index
    %c0_3 = arith.constant 0 : index
    %c0_4 = arith.constant 0 : index
    %4 = vector.load %arg3[%c0_2, %c0_3, %c0_4] : memref<1x128x128xbf16, #tpu.memory_space<vmem>>, vector<1x128x128xbf16>
    %5 = vector.shape_cast %4 : vector<1x128x128xbf16> to vector<128x128xbf16>
    %c0_5 = arith.constant 0 : index
    %c0_6 = arith.constant 0 : index
    %c0_7 = arith.constant 0 : index
    %6 = vector.load %arg4[%c0_5, %c0_6, %c0_7] : memref<1x128x128xbf16, #tpu.memory_space<vmem>>, vector<1x128x128xbf16>
    %7 = vector.shape_cast %6 : vector<1x128x128xbf16> to vector<128x128xbf16>
    %cst = arith.constant dense<0.000000e+00> : vector<128x128xf32>
    %8 = tpu.matmul %5, %7, %cst {dimension_numbers = #tpu.dot_dimension_numbers<[1], [0], [0], [1], [0, 0, 1, 1], [], []>} : vector<128x128xbf16>, vector<128x128xbf16>, vector<128x128xf32> -> vector<128x128xf32>
    %9 = arith.addf %3, %8 : vector<128x128xf32>
    %c0_8 = arith.constant 0 : index
    %c0_9 = arith.constant 0 : index
    %10 = vector.load %arg8[%c0_8, %c0_9] : memref<128x128xf32, #tpu.memory_space<vmem>>, vector<128x128xf32>
    tpu.vector_store %arg8[%c0_8, %c0_9], %9 {strides = array<i32>} : memref<128x128xf32, #tpu.memory_space<vmem>>, vector<128x128xf32>,
    %c0_i32_10 = arith.constant 0 : i32
    %11 = arith.cmpi eq, %arg2, %c0_i32_10 : i32
    %12 = arith.extui %11 : i1 to i32
    %c0_i32_11 = arith.constant 0 : i32
    %13 = arith.cmpi ne, %12, %c0_i32_11 : i32
    scf.if %13 {
      %c0_12 = arith.constant 0 : index
      %c0_13 = arith.constant 0 : index
      %14 = vector.load %arg8[%c0_12, %c0_13] : memref<128x128xf32, #tpu.memory_space<vmem>>, vector<128x128xf32>
      %c0_14 = arith.constant 0 : index
      %c0_15 = arith.constant 0 : index
      %15 = vector.load %arg5[%c0_14, %c0_15] : memref<1x128xf32, #tpu.memory_space<vmem>>, vector<1x128xf32>
      %16 = vector.broadcast %15 : vector<1x128xf32> to vector<128x128xf32>
      %17 = arith.addf %14, %16 : vector<128x128xf32>
      %18 = arith.truncf %17 : vector<128x128xf32> to vector<128x128xbf16>
      %c0_16 = arith.constant 0 : index
      %c0_17 = arith.constant 0 : index
      %c0_18 = arith.constant 0 : index
      %19 = vector.load %arg6[%c0_16, %c0_17, %c0_18] : memref<1x128x128xbf16, #tpu.memory_space<vmem>>, vector<1x128x128xbf16>
      %20 = vector.shape_cast %19 : vector<1x128x128xbf16> to vector<128x128xbf16>
      %21 = vector.shape_cast %18 : vector<128x128xbf16> to vector<1x128x128xbf16>
      tpu.vector_store %arg6[%c0_16, %c0_17, %c0_18], %21 {strides = array<i32>} : memref<1x128x128xbf16, #tpu.memory_space<vmem>>, vector<1x128x128xbf16>,
      %22 = tpu.iota {dimensions = array<i32: 0>} : vector<128x128xi32>
      %c128_i32 = arith.constant 128 : i32
      %23 = arith.muli %arg1, %c128_i32 : i32
      %24 = vector.broadcast %23 : i32 to vector<128x128xi32>
      %25 = arith.addi %22, %24 : vector<128x128xi32>
      %c128_i32_19 = arith.constant 128 : i32
      %26 = vector.broadcast %c128_i32_19 : i32 to vector<128x128xi32>
      %27 = arith.cmpi slt, %25, %26 : vector<128x128xi32>
      %cst_20 = arith.constant 0.000000e+00 : f32
      %28 = vector.broadcast %cst_20 : f32 to vector<128x128xf32>
      %29 = arith.select %27, %17, %28 : vector<128x128xi1>, vector<128x128xf32>
      %cst_21 = arith.constant dense<0.000000e+00> : vector<128xf32>
      %30 = vector.multi_reduction <add>, %29, %cst_21 [0] : vector<128x128xf32> to vector<128xf32>
      %31 = vector.shape_cast %30 : vector<128xf32> to vector<1x128xf32>
      %32 = arith.mulf %29, %29 : vector<128x128xf32>
      %cst_22 = arith.constant dense<0.000000e+00> : vector<128xf32>
      %33 = vector.multi_reduction <add>, %32, %cst_22 [0] : vector<128x128xf32> to vector<128xf32>
      %34 = vector.shape_cast %33 : vector<128xf32> to vector<1x128xf32>
      %35 = tpu.concatenate %31, %34 in 0 : vector<1x128xf32>, vector<1x128xf32> -> vector<2x128xf32>
      %c0_23 = arith.constant 0 : index
      %c0_24 = arith.constant 0 : index
      %c0_25 = arith.constant 0 : index
      %c0_26 = arith.constant 0 : index
      %36 = vector.load %arg7[%c0_23, %c0_24, %c0_25, %c0_26] : memref<1x1x2x128xf32, #tpu.memory_space<vmem>>, vector<1x1x2x128xf32>
      %37 = vector.shape_cast %36 : vector<1x1x2x128xf32> to vector<2x128xf32>
      %38 = vector.shape_cast %35 : vector<2x128xf32> to vector<1x1x2x128xf32>
      tpu.vector_store %arg7[%c0_23, %c0_24, %c0_25, %c0_26], %38 {strides = array<i32>} : memref<1x1x2x128xf32, #tpu.memory_space<vmem>>, vector<1x1x2x128xf32>,
    } else {
    }
    return
  }
  func.func @transform_0(%arg0: i32, %arg1: i32, %arg2: i32) -> (i32, i32, i32) {
    %c0_i32 = arith.constant 0 : i32
    return %arg0, %arg1, %arg2 : i32, i32, i32
  }
  func.func @transform_1(%arg0: i32, %arg1: i32, %arg2: i32) -> (i32, i32, i32) {
    %c0_i32 = arith.constant 0 : i32
    %c0_i32_0 = arith.constant 0 : i32
    return %arg0, %arg2, %c0_i32 : i32, i32, i32
  }
  func.func @transform_2(%arg0: i32, %arg1: i32, %arg2: i32) -> (i32, i32) {
    %c0_i32 = arith.constant 0 : i32
    %c0_i32_0 = arith.constant 0 : i32
    %c0_i32_1 = arith.constant 0 : i32
    return %c0_i32, %c0_i32_0 : i32, i32
  }
  func.func @transform_3(%arg0: i32, %arg1: i32, %arg2: i32) -> (i32, i32, i32) {
    %c0_i32 = arith.constant 0 : i32
    %c0_i32_0 = arith.constant 0 : i32
    return %arg0, %arg1, %c0_i32 : i32, i32, i32
  }
  func.func @transform_4(%arg0: i32, %arg1: i32, %arg2: i32) -> (i32, i32, i32, i32) {
    %c0_i32 = arith.constant 0 : i32
    %c0_i32_0 = arith.constant 0 : i32
    %c0_i32_1 = arith.constant 0 : i32
    return %arg0, %arg1, %c0_i32, %c0_i32_0 : i32, i32, i32, i32
  }
}

module attributes {stable_mosaic.version = 11 : i64} {
  func.func @_fused_gemm_kernel(%arg0: i32, %arg1: i32, %arg2: i32, %arg3: memref<1x512x128xbf16, #tpu.memory_space<vmem>>, %arg4: memref<1x128x128xbf16, #tpu.memory_space<vmem>>, %arg5: memref<1x128xf32, #tpu.memory_space<vmem>>, %arg6: memref<1x512x128xbf16, #tpu.memory_space<vmem>>, %arg7: memref<512x128xf32, #tpu.memory_space<vmem>>) attributes {dimension_semantics = [#tpu.dimension_semantics<parallel>, #tpu.dimension_semantics<parallel>, #tpu.dimension_semantics<arbitrary>], iteration_bounds = array<i64: 4, 1, 1>, scalar_prefetch = 0 : i64, scratch_operands = 1 : i64, tpu.core_type = #tpu.core_type<tc>, window_params = [{transform_indices = @transform_0, window_bounds = array<i64: 1, 512, 128>}, {transform_indices = @transform_1, window_bounds = array<i64: 1, 128, 128>}, {pipeline_mode = #tpu.pipeline_mode<synchronous>, transform_indices = @transform_2, window_bounds = array<i64: 1, 128>}, {transform_indices = @transform_3, window_bounds = array<i64: 1, 512, 128>}]} {
    %c0_i32 = arith.constant 0 : i32
    %0 = arith.cmpi eq, %arg2, %c0_i32 : i32
    %1 = arith.extui %0 : i1 to i32
    %c0_i32_0 = arith.constant 0 : i32
    %2 = arith.cmpi ne, %1, %c0_i32_0 : i32
    scf.if %2 {
      %cst_12 = arith.constant 0.000000e+00 : f32
      %14 = vector.broadcast %cst_12 : f32 to vector<512x128xf32>
      %c0_13 = arith.constant 0 : index
      %c0_14 = arith.constant 0 : index
      %15 = vector.load %arg7[%c0_13, %c0_14] : memref<512x128xf32, #tpu.memory_space<vmem>>, vector<512x128xf32>
      tpu.vector_store %arg7[%c0_13, %c0_14], %14 {strides = array<i32>} : memref<512x128xf32, #tpu.memory_space<vmem>>, vector<512x128xf32>,
    } else {
    }
    %c0 = arith.constant 0 : index
    %c0_1 = arith.constant 0 : index
    %3 = vector.load %arg7[%c0, %c0_1] : memref<512x128xf32, #tpu.memory_space<vmem>>, vector<512x128xf32>
    %c0_2 = arith.constant 0 : index
    %c0_3 = arith.constant 0 : index
    %c0_4 = arith.constant 0 : index
    %4 = vector.load %arg3[%c0_2, %c0_3, %c0_4] : memref<1x512x128xbf16, #tpu.memory_space<vmem>>, vector<1x512x128xbf16>
    %5 = vector.shape_cast %4 : vector<1x512x128xbf16> to vector<512x128xbf16>
    %c0_5 = arith.constant 0 : index
    %c0_6 = arith.constant 0 : index
    %c0_7 = arith.constant 0 : index
    %6 = vector.load %arg4[%c0_5, %c0_6, %c0_7] : memref<1x128x128xbf16, #tpu.memory_space<vmem>>, vector<1x128x128xbf16>
    %7 = vector.shape_cast %6 : vector<1x128x128xbf16> to vector<128x128xbf16>
    %cst = arith.constant dense<0.000000e+00> : vector<512x128xf32>
    %8 = tpu.matmul %5, %7, %cst {dimension_numbers = #tpu.dot_dimension_numbers<[1], [0], [0], [1], [0, 0, 1, 1], [], []>} : vector<512x128xbf16>, vector<128x128xbf16>, vector<512x128xf32> -> vector<512x128xf32>
    %9 = arith.addf %3, %8 : vector<512x128xf32>
    %c0_8 = arith.constant 0 : index
    %c0_9 = arith.constant 0 : index
    %10 = vector.load %arg7[%c0_8, %c0_9] : memref<512x128xf32, #tpu.memory_space<vmem>>, vector<512x128xf32>
    tpu.vector_store %arg7[%c0_8, %c0_9], %9 {strides = array<i32>} : memref<512x128xf32, #tpu.memory_space<vmem>>, vector<512x128xf32>,
    %c0_i32_10 = arith.constant 0 : i32
    %11 = arith.cmpi eq, %arg2, %c0_i32_10 : i32
    %12 = arith.extui %11 : i1 to i32
    %c0_i32_11 = arith.constant 0 : i32
    %13 = arith.cmpi ne, %12, %c0_i32_11 : i32
    scf.if %13 {
      %c0_12 = arith.constant 0 : index
      %c0_13 = arith.constant 0 : index
      %14 = vector.load %arg7[%c0_12, %c0_13] : memref<512x128xf32, #tpu.memory_space<vmem>>, vector<512x128xf32>
      %c0_14 = arith.constant 0 : index
      %c0_15 = arith.constant 0 : index
      %15 = vector.load %arg5[%c0_14, %c0_15] : memref<1x128xf32, #tpu.memory_space<vmem>>, vector<1x128xf32>
      %16 = vector.broadcast %15 : vector<1x128xf32> to vector<512x128xf32>
      %17 = arith.addf %14, %16 : vector<512x128xf32>
      %18 = math.tanh %17 : vector<512x128xf32>
      %19 = arith.truncf %18 : vector<512x128xf32> to vector<512x128xbf16>
      %c0_16 = arith.constant 0 : index
      %c0_17 = arith.constant 0 : index
      %c0_18 = arith.constant 0 : index
      %20 = vector.load %arg6[%c0_16, %c0_17, %c0_18] : memref<1x512x128xbf16, #tpu.memory_space<vmem>>, vector<1x512x128xbf16>
      %21 = vector.shape_cast %20 : vector<1x512x128xbf16> to vector<512x128xbf16>
      %22 = vector.shape_cast %19 : vector<512x128xbf16> to vector<1x512x128xbf16>
      tpu.vector_store %arg6[%c0_16, %c0_17, %c0_18], %22 {strides = array<i32>} : memref<1x512x128xbf16, #tpu.memory_space<vmem>>, vector<1x512x128xbf16>,
    } else {
    }
    return
  }
  func.func @transform_0(%arg0: i32, %arg1: i32, %arg2: i32) -> (i32, i32, i32) {
    %c0_i32 = arith.constant 0 : i32
    return %arg0, %arg1, %arg2 : i32, i32, i32
  }
  func.func @transform_1(%arg0: i32, %arg1: i32, %arg2: i32) -> (i32, i32, i32) {
    %c0_i32 = arith.constant 0 : i32
    %c0_i32_0 = arith.constant 0 : i32
    return %arg0, %arg2, %c0_i32 : i32, i32, i32
  }
  func.func @transform_2(%arg0: i32, %arg1: i32, %arg2: i32) -> (i32, i32) {
    %c0_i32 = arith.constant 0 : i32
    %c0_i32_0 = arith.constant 0 : i32
    %c0_i32_1 = arith.constant 0 : i32
    return %c0_i32, %c0_i32_0 : i32, i32
  }
  func.func @transform_3(%arg0: i32, %arg1: i32, %arg2: i32) -> (i32, i32, i32) {
    %c0_i32 = arith.constant 0 : i32
    %c0_i32_0 = arith.constant 0 : i32
    return %arg0, %arg1, %c0_i32 : i32, i32, i32
  }
}

</mosaic_0001>

<bundles_post_ra>
// kernel: _lambda_.6
= control target key start
LH: loop header
LB: loop body
LE: loop exit
PB: predicated region body
PF: predicated region fallthrough
CT: control target
= control target key end

     0   :  { %s2187_s1 = inlined_call_operand.vmem [shape: bf16[1,128,128], index: 1, kind: input, shape index: {}]   ;;  %s2188_s0 = inlined_call_operand.vmem [shape: bf16[1,512,128], index: 0, kind: input, shape index: {}]   ;;  %s2189_s2 = inlined_call_operand.vmem [shape: f32[1,128], index: 2, kind: input, shape index: {}]   ;;  %s2190_s3 = inlined_call_operand.vmem [shape: bf16[1,512,128], index: 3, kind: output, shape index: {}]  }
   0x1   :  { %v1842_v0 = vld [vmem:[%s2187_s1] sm:$0xff]   ;;  %v1843_v1 = vld [vmem:[%s2187_s1 + $0x8] sm:$0xff]   ;;  %v1844_v2 = vld [vmem:[%s2187_s1 + $0x10] sm:$0xff]  }
   0x2   :  { %1746 = vmatprep.subr.bf16.mxu0 %v1842_v0  ;;  %1826 = vmatprep.subr.bf16.mxu1 %v1842_v0  ;;  %v1845_v3 = vld [vmem:[%s2187_s1 + $0x18] sm:$0xff]   ;;  %v1850_v4 = vld [vmem:[%s2188_s0] sm:$0xff]   ;;  %v1847_v7 = vld [vmem:[%s2187_s1 + $0x28] sm:$0xff]  }
   0x3   :  { %1747 = vmatpush3.bf16.msra.mxu0 %v1842_v0  ;;  %1834 = vmatpush3.bf16.msra.mxu1 %v1842_v0  ;;  %v1851_v5 = vld [vmem:[%s2188_s0 + $0x80] sm:$0xff]   ;;  %v1848_v8 = vld [vmem:[%s2187_s1 + $0x30] sm:$0xff]   ;;  %v1849_v9 = vld [vmem:[%s2187_s1 + $0x38] sm:$0xff]  }
   0x4   :  { %1748 = vmatprep.subr.bf16.mxu0 %v1843_v1  ;;  %1827 = vmatprep.subr.bf16.mxu1 %v1843_v1  ;;  %v1846_v6 = vld [vmem:[%s2187_s1 + $0x20] sm:$0xff]   ;;  %v1852_v10 = vld [vmem:[%s2188_s0 + $0x8] sm:$0xff]   ;;  %v1854_v12 = vld [vmem:[%s2188_s0 + $0x10] sm:$0xff]  }
   0x5   :  { %1762 = vmatprep.mubr.bf16.mxu0 %v1850_v4  ;;  %1794 = vmatprep.mubr.bf16.mxu1 %v1851_v5  ;;  %v1853_v11 = vld [vmem:[%s2188_s0 + $0x88] sm:$0xff]   ;;  %v1855_v13 = vld [vmem:[%s2188_s0 + $0x90] sm:$0xff]   ;;  %v1856_v14 = vld [vmem:[%s2188_s0 + $0x18] sm:$0xff]  }
   0x6   :  { %v1857_v15 = vld [vmem:[%s2188_s0 + $0x98] sm:$0xff]   ;;  %v1858_v16 = vld [vmem:[%s2188_s0 + $0x20] sm:$0xff]   ;;  %v1860_v18 = vld [vmem:[%s2188_s0 + $0x28] sm:$0xff]  }
   0x7   :  { %1749 = vmatpush3.bf16.msra.mxu0 %v1843_v1  ;;  %1835 = vmatpush3.bf16.msra.mxu1 %v1843_v1  ;;  %v1859_v17 = vld [vmem:[%s2188_s0 + $0xa0] sm:$0xff]   ;;  %v1861_v19 = vld [vmem:[%s2188_s0 + $0xa8] sm:$0xff]   ;;  %v1862_v20 = vld [vmem:[%s2188_s0 + $0x30] sm:$0xff]  }
   0x8   :  { %1750 = vmatprep.subr.bf16.mxu0 %v1844_v2  ;;  %1828 = vmatprep.subr.bf16.mxu1 %v1844_v2  ;;  %v1863_v21 = vld [vmem:[%s2188_s0 + $0xb0] sm:$0xff]   ;;  %v1864_v22 = vld [vmem:[%s2188_s0 + $0x38] sm:$0xff]   ;;  %v1866_v24 = vld [vmem:[%s2188_s0 + $0x40] sm:$0xff]  }
   0x9   :  { %v1865_v23 = vld [vmem:[%s2188_s0 + $0xb8] sm:$0xff]   ;;  %v1867_v25 = vld [vmem:[%s2188_s0 + $0xc0] sm:$0xff]   ;;  %v1868_v26 = vld [vmem:[%s2188_s0 + $0x48] sm:$0xff]  }
   0xa   :  { %v1869_v27 = vld [vmem:[%s2188_s0 + $0xc8] sm:$0xff]   ;;  %v1870_v28 = vld [vmem:[%s2188_s0 + $0x50] sm:$0xff]   ;;  %v1872_v30 = vld [vmem:[%s2188_s0 + $0x58] sm:$0xff]  }
   0xb   :  { %1751 = vmatpush3.bf16.msra.mxu0 %v1844_v2  ;;  %1836 = vmatpush3.bf16.msra.mxu1 %v1844_v2  ;;  %v1871_v29 = vld [vmem:[%s2188_s0 + $0xd0] sm:$0xff]   ;;  %v1873_v31 = vld [vmem:[%s2188_s0 + $0xd8] sm:$0xff]   ;;  %v1874_v32 = vld [vmem:[%s2188_s0 + $0x60] sm:$0xff]  }
   0xc   :  { %1752 = vmatprep.subr.bf16.mxu0 %v1845_v3  ;;  %1829 = vmatprep.subr.bf16.mxu1 %v1845_v3  ;;  %v1875_v33 = vld [vmem:[%s2188_s0 + $0xe0] sm:$0xff]   ;;  %v1876_v34 = vld [vmem:[%s2188_s0 + $0x68] sm:$0xff]   ;;  %v1878_v36 = vld [vmem:[%s2188_s0 + $0x70] sm:$0xff]  }
   0xd   :  { %v1877_v35 = vld [vmem:[%s2188_s0 + $0xe8] sm:$0xff]   ;;  %v1879_v37 = vld [vmem:[%s2188_s0 + $0xf0] sm:$0xff]   ;;  %v1880_v38 = vld [vmem:[%s2188_s0 + $0x78] sm:$0xff]  }
   0xe   :  { %v1881_v39 = vld [vmem:[%s2188_s0 + $0xf8] sm:$0xff]   ;;  %v2025_v41 = vld [vmem:[%s2189_s2] ss:$0 sm:$0xff] }
   0xf   :  { %1753 = vmatpush3.bf16.msra.mxu0 %v1845_v3  ;;  %1837 = vmatpush3.bf16.msra.mxu1 %v1845_v3 }
  0x10   :  { %1754 = vmatprep.subr.bf16.mxu0 %v1846_v6  ;;  %1830 = vmatprep.subr.bf16.mxu1 %v1846_v6 }
  0x13   :  { %1755 = vmatpush3.bf16.msra.mxu0 %v1846_v6  ;;  %1838 = vmatpush3.bf16.msra.mxu1 %v1846_v6 }
  0x14   :  { %1756 = vmatprep.subr.bf16.mxu0 %v1847_v7  ;;  %1831 = vmatprep.subr.bf16.mxu1 %v1847_v7 }
  0x17   :  { %1757 = vmatpush3.bf16.msra.mxu0 %v1847_v7  ;;  %1839 = vmatpush3.bf16.msra.mxu1 %v1847_v7 }
  0x18   :  { %1758 = vmatprep.subr.bf16.mxu0 %v1848_v8  ;;  %1832 = vmatprep.subr.bf16.mxu1 %v1848_v8 }
  0x1b   :  { %1759 = vmatpush3.bf16.msra.mxu0 %v1848_v8  ;;  %1840 = vmatpush3.bf16.msra.mxu1 %v1848_v8 }
  0x1c   :  { %1760 = vmatprep.subr.bf16.mxu0 %v1849_v9  ;;  %1833 = vmatprep.subr.bf16.mxu1 %v1849_v9 }
  0x1f   :  { %1761 = vmatpush3.bf16.msra.mxu0 %v1849_v9  ;;  %1841 = vmatpush3.bf16.msra.mxu1 %v1849_v9 }
  0x22   :  { %1763 = vmatmul.mubr.bf16.vlgmr.msra.gmra.mrb[0].mxu0 %v1852_v10  ;;  %1795 = vmatmul.mubr.bf16.vlgmr.msra.gmra.mrb[0].mxu1 %v1853_v11 }
  0x23   :  { %1766 = vmatprep.mubr.bf16.mxu0 %v1854_v12  ;;  %1798 = vmatprep.mubr.bf16.mxu1 %v1855_v13 }
  0x2a   :  { %1767 = vmatmul.mubr.bf16.gmra.mrb[4].mxu0 %v1856_v14  ;;  %1799 = vmatmul.mubr.bf16.gmra.mrb[4].mxu1 %v1857_v15 }
  0x2b   :  { %1770 = vmatprep.mubr.bf16.mxu0 %v1858_v16  ;;  %1802 = vmatprep.mubr.bf16.mxu1 %v1859_v17 }
  0x32   :  { %1771 = vmatmul.mubr.bf16.gmra.mrb[8].mxu0 %v1860_v18  ;;  %1803 = vmatmul.mubr.bf16.gmra.mrb[8].mxu1 %v1861_v19 }
  0x33   :  { %1774 = vmatprep.mubr.bf16.mxu0 %v1862_v20  ;;  %1806 = vmatprep.mubr.bf16.mxu1 %v1863_v21 }
  0x3a   :  { %1775 = vmatmul.mubr.bf16.gmra.mrb[12].mxu0 %v1864_v22  ;;  %1807 = vmatmul.mubr.bf16.gmra.mrb[12].mxu1 %v1865_v23 }
  0x3b   :  { %1778 = vmatprep.mubr.bf16.mxu0 %v1866_v24  ;;  %1810 = vmatprep.mubr.bf16.mxu1 %v1867_v25 }
  0x42   :  { %1779 = vmatmul.mubr.bf16.gmra.mrb[16].mxu0 %v1868_v26  ;;  %1811 = vmatmul.mubr.bf16.gmra.mrb[16].mxu1 %v1869_v27 }
  0x43   :  { %1782 = vmatprep.mubr.bf16.mxu0 %v1870_v28  ;;  %1814 = vmatprep.mubr.bf16.mxu1 %v1871_v29 }
  0x4a   :  { %1783 = vmatmul.mubr.bf16.gmra.mrb[20].mxu0 %v1872_v30  ;;  %1815 = vmatmul.mubr.bf16.gmra.mrb[20].mxu1 %v1873_v31 }
  0x4b   :  { %1786 = vmatprep.mubr.bf16.mxu0 %v1874_v32  ;;  %1818 = vmatprep.mubr.bf16.mxu1 %v1875_v33 }
  0x52   :  { %1787 = vmatmul.mubr.bf16.gmra.mrb[24].mxu0 %v1876_v34  ;;  %1819 = vmatmul.mubr.bf16.gmra.mrb[24].mxu1 %v1877_v35 }
  0x53   :  { %1790 = vmatprep.mubr.bf16.mxu0 %v1878_v36  ;;  %1822 = vmatprep.mubr.bf16.mxu1 %v1879_v37 }
  0x5a   :  { %1791 = vmatmul.mubr.bf16.gmra.mrb[28].mxu0 %v1880_v38  ;;  %1823 = vmatmul.mubr.bf16.gmra.mrb[28].mxu1 %v1881_v39 }
  0xf5   :  { %v1764_v40 = vpop.f32.mrb[0].mxu0  ;;  %v1796_v42 = vpop.f32.mrb[0].mxu1 }
  0xf6   :  { %v501_v43 = vpop.f32.mrb[1].mxu0  ;;  %v629_v44 = vpop.f32.mrb[1].mxu1  ;;  %v960_v47 = vadd.f32 %v1764_v40, %v2025_v41  ;;  %v992_v48 = vadd.f32 %v1796_v42, %v2025_v41 }
  0xf7   :  { %v1765_v45 = vpop.f32.mrb[2].mxu0  ;;  %v1797_v46 = vpop.f32.mrb[2].mxu1  ;;  %v958_v53 = vadd.f32 %v2025_v41, %v501_v43  ;;  %v990_v54 = vadd.f32 %v2025_v41, %v629_v44 }
  0xf8   :  { %v961_v49 = vadd.f32 %v1765_v45, %v2025_v41  ;;  %v993_v50 = vadd.f32 %v1797_v46, %v2025_v41  ;;  %v504_v51 = vpop.f32.mrb[3].mxu0  ;;  %v632_v52 = vpop.f32.mrb[3].mxu1 }
  0xf9   :  { %v959_v55 = vadd.f32 %v2025_v41, %v504_v51  ;;  %v991_v56 = vadd.f32 %v2025_v41, %v632_v52 }
  0xfa   :  { %v1523_v57 = vpack.c.bf16 %v961_v49, %v960_v47  ;;  %v1603_v58 = vpack.c.bf16 %v993_v50, %v992_v48 }
  0xfb   :  { %v1518_v59 = vpack.c.bf16 %v959_v55, %v958_v53  ;;  %v1598_v60 = vpack.c.bf16 %v991_v56, %v990_v54 }
  0xfc   :  { %1675 = vst [vmem:[%s2190_s3 + $0x8] sm:$0xff] %v1523_v57   ;;  %1691 = vst [vmem:[%s2190_s3 + $0x88] sm:$0xff] %v1603_v58  }
  0xfd   :  { %1519 = vst [vmem:[%s2190_s3] sm:$0xff] %v1518_v59   ;;  %1690 = vst [vmem:[%s2190_s3 + $0x80] sm:$0xff] %v1598_v60   ;;  %v1768_v61 = vpop.f32.mrb[4].mxu0  ;;  %v1800_v62 = vpop.f32.mrb[4].mxu1 }
  0xfe   :  { %v517_v63 = vpop.f32.mrb[5].mxu0  ;;  %v645_v0 = vpop.f32.mrb[5].mxu1  ;;  %v964_v3 = vadd.f32 %v1768_v61, %v2025_v41  ;;  %v996_v4 = vadd.f32 %v1800_v62, %v2025_v41 }
  0xff   :  { %v1769_v1 = vpop.f32.mrb[6].mxu0  ;;  %v1801_v2 = vpop.f32.mrb[6].mxu1  ;;  %v962_v9 = vadd.f32 %v2025_v41, %v517_v63  ;;  %v994_v10 = vadd.f32 %v2025_v41, %v645_v0 }
 0x100   :  { %v965_v5 = vadd.f32 %v1769_v1, %v2025_v41  ;;  %v997_v6 = vadd.f32 %v1801_v2, %v2025_v41  ;;  %v520_v7 = vpop.f32.mrb[7].mxu0  ;;  %v648_v8 = vpop.f32.mrb[7].mxu1 }
 0x101   :  { %v963_v11 = vadd.f32 %v2025_v41, %v520_v7  ;;  %v995_v12 = vadd.f32 %v2025_v41, %v648_v8 }
 0x102   :  { %v1533_v13 = vpack.c.bf16 %v965_v5, %v964_v3  ;;  %v1613_v14 = vpack.c.bf16 %v997_v6, %v996_v4 }
 0x103   :  { %v1528_v15 = vpack.c.bf16 %v963_v11, %v962_v9  ;;  %v1608_v16 = vpack.c.bf16 %v995_v12, %v994_v10 }
 0x104   :  { %1677 = vst [vmem:[%s2190_s3 + $0x18] sm:$0xff] %v1533_v13   ;;  %1693 = vst [vmem:[%s2190_s3 + $0x98] sm:$0xff] %v1613_v14  }
 0x105   :  { %1676 = vst [vmem:[%s2190_s3 + $0x10] sm:$0xff] %v1528_v15   ;;  %1692 = vst [vmem:[%s2190_s3 + $0x90] sm:$0xff] %v1608_v16   ;;  %v1772_v17 = vpop.f32.mrb[8].mxu0  ;;  %v1804_v18 = vpop.f32.mrb[8].mxu1 }
 0x106   :  { %v533_v19 = vpop.f32.mrb[9].mxu0  ;;  %v661_v20 = vpop.f32.mrb[9].mxu1  ;;  %v968_v23 = vadd.f32 %v1772_v17, %v2025_v41  ;;  %v1000_v24 = vadd.f32 %v1804_v18, %v2025_v41 }
 0x107   :  { %v1773_v21 = vpop.f32.mrb[10].mxu0  ;;  %v1805_v22 = vpop.f32.mrb[10].mxu1  ;;  %v966_v29 = vadd.f32 %v2025_v41, %v533_v19  ;;  %v998_v30 = vadd.f32 %v2025_v41, %v661_v20 }
 0x108   :  { %v969_v25 = vadd.f32 %v1773_v21, %v2025_v41  ;;  %v1001_v26 = vadd.f32 %v1805_v22, %v2025_v41  ;;  %v536_v27 = vpop.f32.mrb[11].mxu0  ;;  %v664_v28 = vpop.f32.mrb[11].mxu1 }
 0x109   :  { %v967_v31 = vadd.f32 %v2025_v41, %v536_v27  ;;  %v999_v32 = vadd.f32 %v2025_v41, %v664_v28 }
 0x10a   :  { %v1543_v33 = vpack.c.bf16 %v969_v25, %v968_v23  ;;  %v1623_v34 = vpack.c.bf16 %v1001_v26, %v1000_v24 }
 0x10b   :  { %v1538_v35 = vpack.c.bf16 %v967_v31, %v966_v29  ;;  %v1618_v36 = vpack.c.bf16 %v999_v32, %v998_v30 }
 0x10c   :  { %1679 = vst [vmem:[%s2190_s3 + $0x28] sm:$0xff] %v1543_v33   ;;  %1695 = vst [vmem:[%s2190_s3 + $0xa8] sm:$0xff] %v1623_v34  }
 0x10d   :  { %1678 = vst [vmem:[%s2190_s3 + $0x20] sm:$0xff] %v1538_v35   ;;  %1694 = vst [vmem:[%s2190_s3 + $0xa0] sm:$0xff] %v1618_v36   ;;  %v1776_v37 = vpop.f32.mrb[12].mxu0  ;;  %v1808_v38 = vpop.f32.mrb[12].mxu1 }
 0x10e   :  { %v549_v39 = vpop.f32.mrb[13].mxu0  ;;  %v677_v40 = vpop.f32.mrb[13].mxu1  ;;  %v972_v44 = vadd.f32 %v1776_v37, %v2025_v41  ;;  %v1004_v45 = vadd.f32 %v1808_v38, %v2025_v41 }
 0x10f   :  { %v1777_v42 = vpop.f32.mrb[14].mxu0  ;;  %v1809_v43 = vpop.f32.mrb[14].mxu1  ;;  %v970_v50 = vadd.f32 %v2025_v41, %v549_v39  ;;  %v1002_v51 = vadd.f32 %v2025_v41, %v677_v40 }
 0x110   :  { %v973_v46 = vadd.f32 %v1777_v42, %v2025_v41  ;;  %v1005_v47 = vadd.f32 %v1809_v43, %v2025_v41  ;;  %v552_v48 = vpop.f32.mrb[15].mxu0  ;;  %v680_v49 = vpop.f32.mrb[15].mxu1 }
 0x111   :  { %v971_v52 = vadd.f32 %v2025_v41, %v552_v48  ;;  %v1003_v53 = vadd.f32 %v2025_v41, %v680_v49 }
 0x112   :  { %v1553_v54 = vpack.c.bf16 %v973_v46, %v972_v44  ;;  %v1633_v55 = vpack.c.bf16 %v1005_v47, %v1004_v45 }
 0x113   :  { %v1548_v56 = vpack.c.bf16 %v971_v52, %v970_v50  ;;  %v1628_v57 = vpack.c.bf16 %v1003_v53, %v1002_v51 }
 0x114   :  { %1681 = vst [vmem:[%s2190_s3 + $0x38] sm:$0xff] %v1553_v54   ;;  %1697 = vst [vmem:[%s2190_s3 + $0xb8] sm:$0xff] %v1633_v55  }
 0x115   :  { %1680 = vst [vmem:[%s2190_s3 + $0x30] sm:$0xff] %v1548_v56   ;;  %1696 = vst [vmem:[%s2190_s3 + $0xb0] sm:$0xff] %v1628_v57   ;;  %v1780_v58 = vpop.f32.mrb[16].mxu0  ;;  %v1812_v59 = vpop.f32.mrb[16].mxu1 }
 0x116   :  { %v565_v60 = vpop.f32.mrb[17].mxu0  ;;  %v693_v61 = vpop.f32.mrb[17].mxu1  ;;  %v976_v0 = vadd.f32 %v1780_v58, %v2025_v41  ;;  %v1008_v1 = vadd.f32 %v1812_v59, %v2025_v41 }
 0x117   :  { %v1781_v62 = vpop.f32.mrb[18].mxu0  ;;  %v1813_v63 = vpop.f32.mrb[18].mxu1  ;;  %v974_v6 = vadd.f32 %v2025_v41, %v565_v60  ;;  %v1006_v7 = vadd.f32 %v2025_v41, %v693_v61 }
 0x118   :  { %v977_v2 = vadd.f32 %v1781_v62, %v2025_v41  ;;  %v1009_v3 = vadd.f32 %v1813_v63, %v2025_v41  ;;  %v568_v4 = vpop.f32.mrb[19].mxu0  ;;  %v696_v5 = vpop.f32.mrb[19].mxu1 }
 0x119   :  { %v975_v8 = vadd.f32 %v2025_v41, %v568_v4  ;;  %v1007_v9 = vadd.f32 %v2025_v41, %v696_v5 }
 0x11a   :  { %v1563_v10 = vpack.c.bf16 %v977_v2, %v976_v0  ;;  %v1643_v11 = vpack.c.bf16 %v1009_v3, %v1008_v1 }
 0x11b   :  { %v1558_v12 = vpack.c.bf16 %v975_v8, %v974_v6  ;;  %v1638_v13 = vpack.c.bf16 %v1007_v9, %v1006_v7 }
 0x11c   :  { %1683 = vst [vmem:[%s2190_s3 + $0x48] sm:$0xff] %v1563_v10   ;;  %1699 = vst [vmem:[%s2190_s3 + $0xc8] sm:$0xff] %v1643_v11  }
 0x11d   :  { %1682 = vst [vmem:[%s2190_s3 + $0x40] sm:$0xff] %v1558_v12   ;;  %1698 = vst [vmem:[%s2190_s3 + $0xc0] sm:$0xff] %v1638_v13   ;;  %v1784_v14 = vpop.f32.mrb[20].mxu0  ;;  %v1816_v15 = vpop.f32.mrb[20].mxu1 }
 0x11e   :  { %v581_v16 = vpop.f32.mrb[21].mxu0  ;;  %v709_v17 = vpop.f32.mrb[21].mxu1  ;;  %v980_v20 = vadd.f32 %v1784_v14, %v2025_v41  ;;  %v1012_v21 = vadd.f32 %v1816_v15, %v2025_v41 }
 0x11f   :  { %v1785_v18 = vpop.f32.mrb[22].mxu0  ;;  %v1817_v19 = vpop.f32.mrb[22].mxu1  ;;  %v978_v26 = vadd.f32 %v2025_v41, %v581_v16  ;;  %v1010_v27 = vadd.f32 %v2025_v41, %v709_v17 }
 0x120   :  { %v981_v22 = vadd.f32 %v1785_v18, %v2025_v41  ;;  %v1013_v23 = vadd.f32 %v1817_v19, %v2025_v41  ;;  %v584_v24 = vpop.f32.mrb[23].mxu0  ;;  %v712_v25 = vpop.f32.mrb[23].mxu1 }
 0x121   :  { %v979_v28 = vadd.f32 %v2025_v41, %v584_v24  ;;  %v1011_v29 = vadd.f32 %v2025_v41, %v712_v25 }
 0x122   :  { %v1573_v30 = vpack.c.bf16 %v981_v22, %v980_v20  ;;  %v1653_v31 = vpack.c.bf16 %v1013_v23, %v1012_v21 }
 0x123   :  { %v1568_v32 = vpack.c.bf16 %v979_v28, %v978_v26  ;;  %v1648_v33 = vpack.c.bf16 %v1011_v29, %v1010_v27 }
 0x124   :  { %1685 = vst [vmem:[%s2190_s3 + $0x58] sm:$0xff] %v1573_v30   ;;  %1701 = vst [vmem:[%s2190_s3 + $0xd8] sm:$0xff] %v1653_v31  }
 0x125   :  { %1684 = vst [vmem:[%s2190_s3 + $0x50] sm:$0xff] %v1568_v32   ;;  %1700 = vst [vmem:[%s2190_s3 + $0xd0] sm:$0xff] %v1648_v33   ;;  %v1788_v34 = vpop.f32.mrb[24].mxu0  ;;  %v1820_v35 = vpop.f32.mrb[24].mxu1 }
 0x126   :  { %v597_v36 = vpop.f32.mrb[25].mxu0  ;;  %v725_v37 = vpop.f32.mrb[25].mxu1  ;;  %v984_v40 = vadd.f32 %v1788_v34, %v2025_v41  ;;  %v1016_v42 = vadd.f32 %v1820_v35, %v2025_v41 }
 0x127   :  { %v1789_v38 = vpop.f32.mrb[26].mxu0  ;;  %v1821_v39 = vpop.f32.mrb[26].mxu1  ;;  %v982_v47 = vadd.f32 %v2025_v41, %v597_v36  ;;  %v1014_v48 = vadd.f32 %v2025_v41, %v725_v37 }
 0x128   :  { %v985_v43 = vadd.f32 %v1789_v38, %v2025_v41  ;;  %v1017_v44 = vadd.f32 %v1821_v39, %v2025_v41  ;;  %v600_v45 = vpop.f32.mrb[27].mxu0  ;;  %v728_v46 = vpop.f32.mrb[27].mxu1 }
 0x129   :  { %v983_v49 = vadd.f32 %v2025_v41, %v600_v45  ;;  %v1015_v50 = vadd.f32 %v2025_v41, %v728_v46 }
 0x12a   :  { %v1583_v51 = vpack.c.bf16 %v985_v43, %v984_v40  ;;  %v1663_v52 = vpack.c.bf16 %v1017_v44, %v1016_v42 }
 0x12b   :  { %v1578_v53 = vpack.c.bf16 %v983_v49, %v982_v47  ;;  %v1658_v54 = vpack.c.bf16 %v1015_v50, %v1014_v48 }
 0x12c   :  { %1687 = vst [vmem:[%s2190_s3 + $0x68] sm:$0xff] %v1583_v51   ;;  %1703 = vst [vmem:[%s2190_s3 + $0xe8] sm:$0xff] %v1663_v52  }
 0x12d   :  { %1686 = vst [vmem:[%s2190_s3 + $0x60] sm:$0xff] %v1578_v53   ;;  %1702 = vst [vmem:[%s2190_s3 + $0xe0] sm:$0xff] %v1658_v54   ;;  %v1792_v55 = vpop.f32.mrb[28].mxu0  ;;  %v1824_v56 = vpop.f32.mrb[28].mxu1 }
 0x12e   :  { %v613_v57 = vpop.f32.mrb[29].mxu0  ;;  %v741_v58 = vpop.f32.mrb[29].mxu1  ;;  %v988_v61 = vadd.f32 %v1792_v55, %v2025_v41  ;;  %v1020_v62 = vadd.f32 %v1824_v56, %v2025_v41 }
 0x12f   :  { %v1793_v59 = vpop.f32.mrb[30].mxu0  ;;  %v1825_v60 = vpop.f32.mrb[30].mxu1  ;;  %v986_v3 = vadd.f32 %v2025_v41, %v613_v57  ;;  %v1018_v4 = vadd.f32 %v2025_v41, %v741_v58 }
 0x130   :  { %v989_v63 = vadd.f32 %v1793_v59, %v2025_v41  ;;  %v1021_v0 = vadd.f32 %v1825_v60, %v2025_v41  ;;  %v616_v1 = vpop.f32.mrb[31].mxu0  ;;  %v744_v2 = vpop.f32.mrb[31].mxu1 }
 0x131   :  { %v987_v5 = vadd.f32 %v2025_v41, %v616_v1  ;;  %v1019_v6 = vadd.f32 %v2025_v41, %v744_v2 }
 0x132   :  { %v1593_v7 = vpack.c.bf16 %v989_v63, %v988_v61  ;;  %v1673_v8 = vpack.c.bf16 %v1021_v0, %v1020_v62 }
 0x133   :  { %v1588_v9 = vpack.c.bf16 %v987_v5, %v986_v3  ;;  %v1668_v10 = vpack.c.bf16 %v1019_v6, %v1018_v4 }
 0x134   :  { %1689 = vst [vmem:[%s2190_s3 + $0x78] sm:$0xff] %v1593_v7   ;;  %1705 = vst [vmem:[%s2190_s3 + $0xf8] sm:$0xff] %v1673_v8  }
 0x135   :  { %1688 = vst [vmem:[%s2190_s3 + $0x70] sm:$0xff] %v1588_v9   ;;  %1704 = vst [vmem:[%s2190_s3 + $0xf0] sm:$0xff] %v1668_v10  }

// kernel: _lambda_.7
= control target key start
LH: loop header
LB: loop body
LE: loop exit
PB: predicated region body
PF: predicated region fallthrough
CT: control target
= control target key end

     0   :  { %vm557_vm0 = vcmask 1040384   ;;  %s865_s1 = inlined_call_operand.vmem [shape: bf16[1,128,128], index: 1, kind: input, shape index: {}]   ;;  %s866_s0 = inlined_call_operand.vmem [shape: bf16[1,128,128], index: 0, kind: input, shape index: {}]   ;;  %s867_s2 = inlined_call_operand.vmem [shape: f32[1,128], index: 2, kind: input, shape index: {}]   ;;  %s868_s3 = inlined_call_operand.vmem [shape: bf16[1,128,128], index: 3, kind: output, shape index: {0}]   ;;  %s869_s4 = inlined_call_operand.vmem [shape: f32[1,1,2,128], index: 4, kind: output, shape index: {1}]  }
   0x1   :  { %v728_v0 = vld [vmem:[%s865_s1] sm:$0xff]   ;;  %v729_v1 = vld [vmem:[%s865_s1 + $0x8] sm:$0xff]   ;;  %v730_v2 = vld [vmem:[%s865_s1 + $0x10] sm:$0xff]  }
   0x2   :  { %680 = vmatprep.subr.bf16.mxu0 %v728_v0  ;;  %712 = vmatprep.subr.bf16.mxu1 %v728_v0  ;;  %v731_v3 = vld [vmem:[%s865_s1 + $0x18] sm:$0xff]   ;;  %v736_v4 = vld [vmem:[%s866_s0] sm:$0xff]   ;;  %v733_v7 = vld [vmem:[%s865_s1 + $0x28] sm:$0xff]  }
   0x3   :  { %681 = vmatpush3.bf16.msra.mxu0 %v728_v0  ;;  %720 = vmatpush3.bf16.msra.mxu1 %v728_v0  ;;  %v732_v5 = vld [vmem:[%s865_s1 + $0x20] sm:$0xff]   ;;  %v734_v8 = vld [vmem:[%s865_s1 + $0x30] sm:$0xff]   ;;  %v735_v9 = vld [vmem:[%s865_s1 + $0x38] sm:$0xff]  }
   0x4   :  { %682 = vmatprep.subr.bf16.mxu0 %v729_v1  ;;  %713 = vmatprep.subr.bf16.mxu1 %v729_v1  ;;  %v740_v6 = vld [vmem:[%s866_s0 + $0x20] sm:$0xff]   ;;  %v737_v10 = vld [vmem:[%s866_s0 + $0x8] sm:$0xff]   ;;  %v738_v12 = vld [vmem:[%s866_s0 + $0x10] sm:$0xff]  }
   0x5   :  { %696 = vmatprep.mubr.bf16.mxu0 %v736_v4  ;;  %704 = vmatprep.mubr.bf16.mxu1 %v740_v6  ;;  %v741_v11 = vld [vmem:[%s866_s0 + $0x28] sm:$0xff]   ;;  %v742_v13 = vld [vmem:[%s866_s0 + $0x30] sm:$0xff]   ;;  %v739_v14 = vld [vmem:[%s866_s0 + $0x18] sm:$0xff]  }
   0x6   :  { %v743_v15 = vld [vmem:[%s866_s0 + $0x38] sm:$0xff]   ;;  %v584_v16 = vld [vmem:[%s867_s2] ss:$0 sm:$0xff] }
   0x7   :  { %683 = vmatpush3.bf16.msra.mxu0 %v729_v1  ;;  %721 = vmatpush3.bf16.msra.mxu1 %v729_v1 }
   0x8   :  { %684 = vmatprep.subr.bf16.mxu0 %v730_v2  ;;  %714 = vmatprep.subr.bf16.mxu1 %v730_v2 }
   0xb   :  { %685 = vmatpush3.bf16.msra.mxu0 %v730_v2  ;;  %722 = vmatpush3.bf16.msra.mxu1 %v730_v2 }
   0xc   :  { %686 = vmatprep.subr.bf16.mxu0 %v731_v3  ;;  %715 = vmatprep.subr.bf16.mxu1 %v731_v3 }
   0xf   :  { %687 = vmatpush3.bf16.msra.mxu0 %v731_v3  ;;  %723 = vmatpush3.bf16.msra.mxu1 %v731_v3 }
  0x10   :  { %688 = vmatprep.subr.bf16.mxu0 %v732_v5  ;;  %716 = vmatprep.subr.bf16.mxu1 %v732_v5 }
  0x13   :  { %689 = vmatpush3.bf16.msra.mxu0 %v732_v5  ;;  %724 = vmatpush3.bf16.msra.mxu1 %v732_v5 }
  0x14   :  { %690 = vmatprep.subr.bf16.mxu0 %v733_v7  ;;  %717 = vmatprep.subr.bf16.mxu1 %v733_v7 }
  0x17   :  { %691 = vmatpush3.bf16.msra.mxu0 %v733_v7  ;;  %725 = vmatpush3.bf16.msra.mxu1 %v733_v7 }
  0x18   :  { %692 = vmatprep.subr.bf16.mxu0 %v734_v8  ;;  %718 = vmatprep.subr.bf16.mxu1 %v734_v8 }
  0x1b   :  { %693 = vmatpush3.bf16.msra.mxu0 %v734_v8  ;;  %726 = vmatpush3.bf16.msra.mxu1 %v734_v8 }
  0x1c   :  { %694 = vmatprep.subr.bf16.mxu0 %v735_v9  ;;  %719 = vmatprep.subr.bf16.mxu1 %v735_v9 }
  0x1f   :  { %695 = vmatpush3.bf16.msra.mxu0 %v735_v9  ;;  %727 = vmatpush3.bf16.msra.mxu1 %v735_v9 }
  0x22   :  { %697 = vmatmul.mubr.bf16.vlgmr.msra.gmra.mrb[0].mxu0 %v737_v10  ;;  %705 = vmatmul.mubr.bf16.vlgmr.msra.gmra.mrb[0].mxu1 %v741_v11 }
  0x23   :  { %700 = vmatprep.mubr.bf16.mxu0 %v738_v12  ;;  %708 = vmatprep.mubr.bf16.mxu1 %v742_v13 }
  0x2a   :  { %701 = vmatmul.mubr.bf16.gmra.mrb[4].mxu0 %v739_v14  ;;  %709 = vmatmul.mubr.bf16.gmra.mrb[4].mxu1 %v743_v15 }
  0xf5   :  { %v698_v17 = vpop.f32.mrb[0].mxu0  ;;  %v706_v18 = vpop.f32.mrb[0].mxu1 }
  0xf6   :  { %v215_v19 = vpop.f32.mrb[1].mxu0  ;;  %v820_v20 = vadd.f32 %v706_v18, %v584_v16  ;;  %v247_v21 = vpop.f32.mrb[1].mxu1  ;;  %v338_v26 = vadd.f32 %v698_v17, %v584_v16 }
  0xf7   :  { %v336_v22 = vadd.f32 %v584_v16, %v215_v19  ;;  %v699_v23 = vpop.f32.mrb[2].mxu0  ;;  %v822_v24 = vadd.f32 %v584_v16, %v247_v21  ;;  %v707_v25 = vpop.f32.mrb[2].mxu1 }
  0xf8   :  { %v339_v27 = vadd.f32 %v699_v23, %v584_v16  ;;  %v218_v28 = vpop.f32.mrb[3].mxu0  ;;  %v824_v29 = vadd.f32 %v707_v25, %v584_v16  ;;  %v250_v30 = vpop.f32.mrb[3].mxu1  ;;  %v522_v40 = vmul.f32 %v338_v26, %v338_v26  ;;  %v530_v21 = vmul.f32 %v820_v20, %v820_v20 }
  0xf9   :  { %v337_v31 = vadd.f32 %v584_v16, %v218_v28  ;;  %v345_v32 = vadd.f32 %v584_v16, %v250_v30  ;;  %v520_v33 = vmul.f32 %v336_v22, %v336_v22  ;;  %v528_v14 = vmul.f32 %v822_v24, %v822_v24 }
  0xfa   :  { %v625_v34 = vpack.c.bf16 %v339_v27, %v338_v26  ;;  %v645_v35 = vpack.c.bf16 %v824_v29, %v820_v20  ;;  %v523_v48 = vmul.f32 %v339_v27, %v339_v27  ;;  %v531_v25 = vmul.f32 %v824_v29, %v824_v29 }
  0xfb   :  { %v620_v36 = vpack.c.bf16 %v337_v31, %v336_v22  ;;  %v499_v37 = vadd.f32 %v337_v31, %v336_v22  ;;  %v521_v38 = vmul.f32 %v337_v31, %v337_v31  ;;  %v640_v39 = vpack.c.bf16 %v345_v32, %v822_v24 }
  0xfc   :  { %657 = vst [vmem:[%s868_s3 + $0x8] sm:$0xff] %v625_v34   ;;  %661 = vst [vmem:[%s868_s3 + $0x28] sm:$0xff] %v645_v35   ;;  %v529_v19 = vmul.f32 %v345_v32, %v345_v32 }
  0xfd   :  { %621 = vst [vmem:[%s868_s3] sm:$0xff] %v620_v36   ;;  %v500_v41 = vadd.f32 %v499_v37, %v338_v26  ;;  %v536_v42 = vadd.f32 %v521_v38, %v520_v33  ;;  %v702_v43 = vpop.f32.mrb[4].mxu0  ;;  %660 = vst [vmem:[%s868_s3 + $0x20] sm:$0xff] %v640_v39   ;;  %v710_v44 = vpop.f32.mrb[4].mxu1 }
  0xfe   :  { %v231_v45 = vpop.f32.mrb[5].mxu0  ;;  %v350_v46 = vadd.f32 %v710_v44, %v584_v16  ;;  %v263_v47 = vpop.f32.mrb[5].mxu1  ;;  %v342_v54 = vadd.f32 %v702_v43, %v584_v16 }
  0xff   :  { %v537_v49 = vadd.f32 %v536_v42, %v522_v40  ;;  %v340_v50 = vadd.f32 %v584_v16, %v231_v45  ;;  %v501_v51 = vadd.f32 %v500_v41, %v339_v27  ;;  %v703_v52 = vpop.f32.mrb[6].mxu0  ;;  %v711_v53 = vpop.f32.mrb[6].mxu1  ;;  %v348_v0 = vadd.f32 %v584_v16, %v263_v47 }
 0x100   :  { %v343_v55 = vadd.f32 %v703_v52, %v584_v16  ;;  %v234_v56 = vpop.f32.mrb[7].mxu0  ;;  %v351_v57 = vadd.f32 %v711_v53, %v584_v16  ;;  %v266_v58 = vpop.f32.mrb[7].mxu1  ;;  %v526_v7 = vmul.f32 %v342_v54, %v342_v54  ;;  %v534_v35 = vmul.f32 %v350_v46, %v350_v46 }
 0x101   :  { %v502_v59 = vadd.f32 %v501_v51, %v340_v50  ;;  %v524_v60 = vmul.f32 %v340_v50, %v340_v50  ;;  %v538_v61 = vadd.f32 %v537_v49, %v523_v48  ;;  %v341_v62 = vadd.f32 %v584_v16, %v234_v56 }
 0x102   :  { %v635_v63 = vpack.c.bf16 %v343_v55, %v342_v54  ;;  %v655_v1 = vpack.c.bf16 %v351_v57, %v350_v46  ;;  %v349_v6 = vadd.f32 %v584_v16, %v266_v58  ;;  %v527_v11 = vmul.f32 %v343_v55, %v343_v55 }
 0x103   :  { %v539_v2 = vadd.f32 %v538_v61, %v524_v60  ;;  %v630_v3 = vpack.c.bf16 %v341_v62, %v340_v50  ;;  %v503_v4 = vadd.f32 %v502_v59, %v341_v62  ;;  %v525_v5 = vmul.f32 %v341_v62, %v341_v62 }
 0x104   :  { %659 = vst [vmem:[%s868_s3 + $0x18] sm:$0xff] %v635_v63   ;;  %663 = vst [vmem:[%s868_s3 + $0x38] sm:$0xff] %v655_v1   ;;  %v650_v10 = vpack.c.bf16 %v349_v6, %v348_v0  ;;  %v532_v28 = vmul.f32 %v348_v0, %v348_v0  ;;  %v533_v34 = vmul.f32 %v349_v6, %v349_v6 }
 0x105   :  { %658 = vst [vmem:[%s868_s3 + $0x10] sm:$0xff] %v630_v3   ;;  %v504_v8 = vadd.f32 %v503_v4, %v342_v54  ;;  %v540_v9 = vadd.f32 %v539_v2, %v525_v5  ;;  %v535_v37 = vmul.f32 %v351_v57, %v351_v57 }
 0x106   :  { %662 = vst [vmem:[%s868_s3 + $0x30] sm:$0xff] %v650_v10  }
 0x107   :  { %v541_v12 = vadd.f32 %v540_v9, %v526_v7  ;;  %v505_v13 = vadd.f32 %v504_v8, %v343_v55 }
 0x109   :  { %v506_v15 = vadd.f32 %v505_v13, %v822_v24  ;;  %v542_v16 = vadd.f32 %v541_v12, %v527_v11 }
 0x10b   :  { %v543_v17 = vadd.f32 %v542_v16, %v528_v14  ;;  %v507_v18 = vadd.f32 %v506_v15, %v345_v32 }
 0x10d   :  { %v508_v22 = vadd.f32 %v507_v18, %v820_v20  ;;  %v544_v23 = vadd.f32 %v543_v17, %v529_v19 }
 0x10f   :  { %v545_v26 = vadd.f32 %v544_v23, %v530_v21  ;;  %v509_v27 = vadd.f32 %v508_v22, %v824_v29 }
 0x111   :  { %v510_v30 = vadd.f32 %v509_v27, %v348_v0  ;;  %v546_v31 = vadd.f32 %v545_v26, %v531_v25 }
 0x113   :  { %v547_v24 = vadd.f32 %v546_v31, %v532_v28  ;;  %v511_v33 = vadd.f32 %v510_v30, %v349_v6 }
 0x115   :  { %v512_v32 = vadd.f32 %v511_v33, %v350_v46  ;;  %v548_v36 = vadd.f32 %v547_v24, %v533_v34 }
 0x117   :  { %v513_v38 = vadd.f32 %v512_v32, %v351_v57  ;;  %v549_v39 = vadd.f32 %v548_v36, %v534_v35 }
 0x119   :  { %v514_v20 = vrot.slane %v513_v38, 4  ;;  %v550_v40 = vadd.f32 %v549_v39, %v535_v37 }
 0x11b   :  { %v515_v41 = vadd.f32 %v514_v20, %v513_v38  ;;  %v551_v42 = vrot.slane %v550_v40, 4 }
 0x11d   :  { %v516_v43 = vrot.slane %v515_v41, 2  ;;  %v552_v44 = vadd.f32 %v551_v42, %v550_v40 }
 0x11f   :  { %v517_v45 = vadd.f32 %v516_v43, %v515_v41  ;;  %v553_v29 = vrot.slane %v552_v44, 2 }
 0x121   :  { %v518_v47 = vrot.slane %v517_v45, 1  ;;  %v554_v48 = vadd.f32 %v553_v29, %v552_v44 }
 0x123   :  { %v555_v49 = vrot.slane %v554_v48, 1  ;;  %v519_v50 = vadd.f32 %v518_v47, %v517_v45 }
 0x125   :  { %v556_v51 = vadd.f32 %v555_v49, %v554_v48 }
 0x127   :  { %v558_v52 = vsel %vm557_vm0, %v519_v50, %v556_v51 }
 0x128   :  { %559 = vst [vmem:[%s869_s4] sm:$0x3] %v558_v52 }

// kernel: _lambda_.8
= control target key start
LH: loop header
LB: loop body
LE: loop exit
PB: predicated region body
PF: predicated region fallthrough
CT: control target
= control target key end

     0   :  { %vm317_vm0 = vcmask 1040384   ;;  %s531_s1 = inlined_call_operand.vmem [shape: bf16[1,256,128], index: 1, kind: input, shape index: {}]   ;;  %s532_s0 = inlined_call_operand.vmem [shape: bf16[1,32,256], index: 0, kind: input, shape index: {}]   ;;  %s533_s2 = inlined_call_operand.vmem [shape: f32[1,128], index: 2, kind: input, shape index: {}]   ;;  %s534_s3 = inlined_call_operand.vmem [shape: bf16[1,32,128], index: 3, kind: output, shape index: {0}]   ;;  %s535_s4 = inlined_call_operand.vmem [shape: f32[1,1,2,128], index: 4, kind: output, shape index: {1}]  }
   0x1   :  { %v412_v0 = vld [vmem:[%s531_s1 + $0x40] sm:$0xff]   ;;  %v414_v2 = vld [vmem:[%s531_s1 + $0x48] sm:$0xff]   ;;  %v416_v4 = vld [vmem:[%s531_s1 + $0x50] sm:$0xff]  }
   0x2   :  { %v413_v1 = vld [vmem:[%s531_s1] sm:$0xff]   ;;  %368 = vmatprep.subr.bf16.mxu0 %v412_v0  ;;  %396 = vmatprep.subr.bf16.mxu1 %v412_v0  ;;  %v415_v3 = vld [vmem:[%s531_s1 + $0x8] sm:$0xff]   ;;  %v417_v5 = vld [vmem:[%s531_s1 + $0x10] sm:$0xff]  }
   0x3   :  { %369 = vmatpush3.bf16.msra.mxu0 %v413_v1  ;;  %404 = vmatpush3.bf16.msra.mxu1 %v413_v1  ;;  %v418_v6 = vld [vmem:[%s531_s1 + $0x58] sm:$0xff]   ;;  %v420_v8 = vld [vmem:[%s531_s1 + $0x60] sm:$0xff]   ;;  %v422_v10 = vld [vmem:[%s531_s1 + $0x68] sm:$0xff]  }
   0x4   :  { %370 = vmatprep.subr.bf16.mxu0 %v414_v2  ;;  %397 = vmatprep.subr.bf16.mxu1 %v414_v2  ;;  %v419_v7 = vld [vmem:[%s531_s1 + $0x18] sm:$0xff]   ;;  %v421_v9 = vld [vmem:[%s531_s1 + $0x20] sm:$0xff]   ;;  %v423_v13 = vld [vmem:[%s531_s1 + $0x28] sm:$0xff]  }
   0x5   :  { %v430_v11 = vld [vmem:[%s532_s0 + $0x4] ss:$8 sps:$4 sm:$0xff]   ;;  %v433_v12 = vld [vmem:[%s532_s0 + $0x14] ss:$8 sps:$4 sm:$0xff]   ;;  %v428_v18 = vld [vmem:[%s532_s0] ss:$8 sps:$4 sm:$0xff]  }
   0x6   :  { %v424_v14 = vld [vmem:[%s531_s1 + $0x70] sm:$0xff]   ;;  %213 = vmatprep.mubr.bf16.mxu0 %v430_v11  ;;  %221 = vmatprep.mubr.bf16.mxu1 %v433_v12  ;;  %v426_v16 = vld [vmem:[%s531_s1 + $0x78] sm:$0xff]   ;;  %v348_v23 = vld [vmem:[%s533_s2] ss:$0 sm:$0xff] }
   0x7   :  { %371 = vmatpush3.bf16.msra.mxu0 %v415_v3  ;;  %405 = vmatpush3.bf16.msra.mxu1 %v415_v3  ;;  %v425_v15 = vld [vmem:[%s531_s1 + $0x30] sm:$0xff]   ;;  %v427_v17 = vld [vmem:[%s531_s1 + $0x38] sm:$0xff]  }
   0x8   :  { %372 = vmatprep.subr.bf16.mxu0 %v416_v4  ;;  %398 = vmatprep.subr.bf16.mxu1 %v416_v4  ;;  %v431_v19 = vld [vmem:[%s532_s0 + $0x10] ss:$8 sps:$4 sm:$0xff]  }
   0xb   :  { %373 = vmatpush3.bf16.msra.mxu0 %v417_v5  ;;  %406 = vmatpush3.bf16.msra.mxu1 %v417_v5 }
   0xc   :  { %374 = vmatprep.subr.bf16.mxu0 %v418_v6  ;;  %399 = vmatprep.subr.bf16.mxu1 %v418_v6 }
   0xf   :  { %375 = vmatpush3.bf16.msra.mxu0 %v419_v7  ;;  %407 = vmatpush3.bf16.msra.mxu1 %v419_v7 }
  0x10   :  { %376 = vmatprep.subr.bf16.mxu0 %v420_v8  ;;  %400 = vmatprep.subr.bf16.mxu1 %v420_v8 }
  0x13   :  { %377 = vmatpush3.bf16.msra.mxu0 %v421_v9  ;;  %408 = vmatpush3.bf16.msra.mxu1 %v421_v9 }
  0x14   :  { %378 = vmatprep.subr.bf16.mxu0 %v422_v10  ;;  %401 = vmatprep.subr.bf16.mxu1 %v422_v10 }
  0x17   :  { %379 = vmatpush3.bf16.msra.mxu0 %v423_v13  ;;  %409 = vmatpush3.bf16.msra.mxu1 %v423_v13 }
  0x18   :  { %380 = vmatprep.subr.bf16.mxu0 %v424_v14  ;;  %402 = vmatprep.subr.bf16.mxu1 %v424_v14 }
  0x1b   :  { %381 = vmatpush3.bf16.msra.mxu0 %v425_v15  ;;  %410 = vmatpush3.bf16.msra.mxu1 %v425_v15 }
  0x1c   :  { %382 = vmatprep.subr.bf16.mxu0 %v426_v16  ;;  %403 = vmatprep.subr.bf16.mxu1 %v426_v16 }
  0x1f   :  { %383 = vmatpush3.bf16.msra.mxu0 %v427_v17  ;;  %411 = vmatpush3.bf16.msra.mxu1 %v427_v17 }
  0x22   :  { %214 = vmatmul.mubr.bf16.vlgmr.msra.gmra.mrb[0].mxu0 %v428_v18  ;;  %222 = vmatmul.mubr.bf16.vlgmr.msra.gmra.mrb[0].mxu1 %v431_v19 }
  0xf5   :  { %v384_v20 = vpop.f32.mrb[0].mxu0  ;;  %v390_v21 = vpop.f32.mrb[0].mxu1 }
  0xf6   :  { %v385_v22 = vpop.f32.mrb[1].mxu0  ;;  %v391_v24 = vpop.f32.mrb[1].mxu1 }
  0xf7   :  { %v386_v25 = vadd.f32 %v385_v22, %v384_v20  ;;  %v387_v26 = vpop.f32.mrb[2].mxu0  ;;  %v392_v27 = vadd.f32 %v391_v24, %v390_v21  ;;  %v393_v28 = vpop.f32.mrb[2].mxu1 }
  0xf8   :  { %v388_v29 = vpop.f32.mrb[3].mxu0  ;;  %v394_v30 = vpop.f32.mrb[3].mxu1 }
  0xf9   :  { %v252_v31 = vadd.f32 %v386_v25, %v348_v23  ;;  %v254_v32 = vadd.f32 %v392_v27, %v348_v23  ;;  %v389_v33 = vadd.f32 %v388_v29, %v387_v26  ;;  %v395_v34 = vadd.f32 %v394_v30, %v393_v28 }
  0xfb   :  { %v253_v35 = vadd.f32 %v389_v33, %v348_v23  ;;  %v255_v36 = vadd.f32 %v395_v34, %v348_v23  ;;  %v304_v37 = vmul.f32 %v252_v31, %v252_v31  ;;  %v306_v38 = vmul.f32 %v254_v32, %v254_v32 }
  0xfd   :  { %v360_v39 = vpack.c.bf16 %v253_v35, %v252_v31  ;;  %v295_v40 = vadd.f32 %v253_v35, %v252_v31  ;;  %v305_v41 = vmul.f32 %v253_v35, %v253_v35  ;;  %v365_v42 = vpack.c.bf16 %v255_v36, %v254_v32 }
  0xfe   :  { %v307_v46 = vmul.f32 %v255_v36, %v255_v36 }
  0xff   :  { %361 = vst [vmem:[%s534_s3] sm:$0xff] %v360_v39   ;;  %v308_v43 = vadd.f32 %v305_v41, %v304_v37  ;;  %367 = vst [vmem:[%s534_s3 + $0x8] sm:$0xff] %v365_v42   ;;  %v296_v44 = vadd.f32 %v295_v40, %v254_v32 }
 0x101   :  { %v297_v45 = vadd.f32 %v296_v44, %v255_v36  ;;  %v309_v47 = vadd.f32 %v308_v43, %v306_v38 }
 0x103   :  { %v298_v48 = vrot.slane %v297_v45, 4  ;;  %v310_v49 = vadd.f32 %v309_v47, %v307_v46 }
 0x105   :  { %v299_v50 = vadd.f32 %v298_v48, %v297_v45  ;;  %v311_v51 = vrot.slane %v310_v49, 4 }
 0x107   :  { %v300_v52 = vrot.slane %v299_v50, 2  ;;  %v312_v53 = vadd.f32 %v311_v51, %v310_v49 }
 0x109   :  { %v301_v54 = vadd.f32 %v300_v52, %v299_v50  ;;  %v313_v55 = vrot.slane %v312_v53, 2 }
 0x10b   :  { %v302_v56 = vrot.slane %v301_v54, 1  ;;  %v314_v57 = vadd.f32 %v313_v55, %v312_v53 }
 0x10d   :  { %v315_v58 = vrot.slane %v314_v57, 1  ;;  %v303_v59 = vadd.f32 %v302_v56, %v301_v54 }
 0x10f   :  { %v316_v60 = vadd.f32 %v315_v58, %v314_v57 }
 0x111   :  { %v318_v61 = vsel %vm317_vm0, %v303_v59, %v316_v60 }
 0x112   :  { %319 = vst [vmem:[%s535_s4] sm:$0x3] %v318_v61 }

// kernel: _lambda_.9
= control target key start
LH: loop header
LB: loop body
LE: loop exit
PB: predicated region body
PF: predicated region fallthrough
CT: control target
= control target key end

     0   :  { %s973_s15 = smov 0   ;;  %s975_s16 = smov 0   ;;  %s1039_s0 = inlined_call_operand.vmem [shape: bf16[4,32,256], index: 0, kind: input, shape index: {}]   ;;  %s1040_s1 = inlined_call_operand.vmem [shape: bf16[4,256,128], index: 1, kind: input, shape index: {}]   ;;  %s1041_s2 = inlined_call_operand.vmem [shape: f32[1,128], index: 2, kind: input, shape index: {}]   ;;  %s1042_s3 = inlined_call_operand.vmem [shape: bf16[4,32,128], index: 3, kind: output, shape index: {0}]   ;;  %s1043_s4 = inlined_call_operand.vmem [shape: f32[4,1,2,128], index: 4, kind: output, shape index: {1}]  }
   0x1   :  { %s977_s17 = smov 0  }
   0x2 LB: > { %s34_s18 = sadd.s32 1, %s942_s16  ;;  %p781_p0 = scmp.ge.s32.totalorder %s946_s17, 1  ;;  %s946_s17 = sphi %s977_s17, %s15_s17   ;;  %s942_s16 = sphi %s975_s16, %s1045_s16   ;;  %s938_s15 = sphi %s973_s15, %s1044_s15  }
   0x3   : > { %p36_p1 = scmp.ge.s32.totalorder %s34_s18, 4  ;;  %p220_p2 = scmp.lt.s32.totalorder %s946_s17, 5 }
   0x5   : > { %s1047_s18 = smov (%p36_p1, %s34_s18), 0  ;;  %p221_p3 = pnand %p781_p0, %p220_p2 }
   0x6   : > { %p277_p4 = scmp.lt.s32.totalorder (!%p221_p3), %s938_s15, 3  ;;  %v809_v23 = vld [vmem:[%s1041_s2] ss:$0 sm:$0xff] (!%p221_p3)  ;;  %vm619_vm0 = vcmask (!%p221_p3), 1040384  }
   0x7   : > { %224 = sbr.rel (%p221_p3) target bundleno = 291 (0x123), region = 32 }
   0xe   : > { %s1049_s15 = smov (!%p277_p4, %s938_s15), 3 }
   0xf   : > { %s817_s19 = sshll.u32 %s1049_s15, 7  ;;  %s816_s23 = sshll.u32 %s1049_s15, 5 }
  0x10   : > { %s997_s22 = scalar_lea.vmem %s1040_s1, %s817_s19  ;;  %s288_s26 = scalar_lea.vmem %s1039_s0, %s816_s23 }
  0x11   : > { %v902_v0 = vld [vmem:[%s997_s22 + $0x40] sm:$0xff]   ;;  %v904_v2 = vld [vmem:[%s997_s22 + $0x48] sm:$0xff]   ;;  %v906_v4 = vld [vmem:[%s997_s22 + $0x50] sm:$0xff]   ;;  %s818_s29 = sshll.u32 %s1049_s15, 4  ;;  %s788_s7 = sshll.u32 %s1049_s15, 1 }
  0x12   : > { %v903_v1 = vld [vmem:[%s997_s22] sm:$0xff]   ;;  %834 = vmatprep.subr.bf16.mxu0 %v902_v0  ;;  %862 = vmatprep.subr.bf16.mxu1 %v902_v0  ;;  %v905_v3 = vld [vmem:[%s997_s22 + $0x8] sm:$0xff]   ;;  %v907_v5 = vld [vmem:[%s997_s22 + $0x10] sm:$0xff]   ;;  %s309_s6 = scalar_lea.vmem %s1042_s3, %s818_s29  ;;  %s317_s10 = scalar_lea.vmem %s1043_s4, %s788_s7 }
  0x13   : > { %835 = vmatpush3.bf16.msra.mxu0 %v903_v1  ;;  %870 = vmatpush3.bf16.msra.mxu1 %v903_v1  ;;  %v908_v6 = vld [vmem:[%s997_s22 + $0x58] sm:$0xff]   ;;  %v910_v8 = vld [vmem:[%s997_s22 + $0x60] sm:$0xff]   ;;  %v912_v10 = vld [vmem:[%s997_s22 + $0x68] sm:$0xff]  }
  0x14   : > { %836 = vmatprep.subr.bf16.mxu0 %v904_v2  ;;  %863 = vmatprep.subr.bf16.mxu1 %v904_v2  ;;  %v909_v7 = vld [vmem:[%s997_s22 + $0x18] sm:$0xff]   ;;  %v911_v9 = vld [vmem:[%s997_s22 + $0x20] sm:$0xff]   ;;  %v913_v13 = vld [vmem:[%s997_s22 + $0x28] sm:$0xff]  }
  0x15   : > { %v920_v11 = vld [vmem:[%s288_s26 + $0x4] ss:$8 sps:$4 sm:$0xff]   ;;  %v923_v12 = vld [vmem:[%s288_s26 + $0x14] ss:$8 sps:$4 sm:$0xff]   ;;  %v918_v18 = vld [vmem:[%s288_s26] ss:$8 sps:$4 sm:$0xff]  }
  0x16   : > { %v914_v14 = vld [vmem:[%s997_s22 + $0x70] sm:$0xff]   ;;  %515 = vmatprep.mubr.bf16.mxu0 %v920_v11  ;;  %523 = vmatprep.mubr.bf16.mxu1 %v923_v12  ;;  %v916_v16 = vld [vmem:[%s997_s22 + $0x78] sm:$0xff]  }
  0x17   : > { %837 = vmatpush3.bf16.msra.mxu0 %v905_v3  ;;  %871 = vmatpush3.bf16.msra.mxu1 %v905_v3  ;;  %v915_v15 = vld [vmem:[%s997_s22 + $0x30] sm:$0xff]   ;;  %v917_v17 = vld [vmem:[%s997_s22 + $0x38] sm:$0xff]  }
  0x18   : > { %838 = vmatprep.subr.bf16.mxu0 %v906_v4  ;;  %864 = vmatprep.subr.bf16.mxu1 %v906_v4  ;;  %v921_v19 = vld [vmem:[%s288_s26 + $0x10] ss:$8 sps:$4 sm:$0xff]  }
  0x1b   : > { %839 = vmatpush3.bf16.msra.mxu0 %v907_v5  ;;  %872 = vmatpush3.bf16.msra.mxu1 %v907_v5 }
  0x1c   : > { %840 = vmatprep.subr.bf16.mxu0 %v908_v6  ;;  %865 = vmatprep.subr.bf16.mxu1 %v908_v6 }
  0x1f   : > { %841 = vmatpush3.bf16.msra.mxu0 %v909_v7  ;;  %873 = vmatpush3.bf16.msra.mxu1 %v909_v7 }
  0x20   : > { %842 = vmatprep.subr.bf16.mxu0 %v910_v8  ;;  %866 = vmatprep.subr.bf16.mxu1 %v910_v8 }
  0x23   : > { %843 = vmatpush3.bf16.msra.mxu0 %v911_v9  ;;  %874 = vmatpush3.bf16.msra.mxu1 %v911_v9 }
  0x24   : > { %844 = vmatprep.subr.bf16.mxu0 %v912_v10  ;;  %867 = vmatprep.subr.bf16.mxu1 %v912_v10 }
  0x27   : > { %845 = vmatpush3.bf16.msra.mxu0 %v913_v13  ;;  %875 = vmatpush3.bf16.msra.mxu1 %v913_v13 }
  0x28   : > { %846 = vmatprep.subr.bf16.mxu0 %v914_v14  ;;  %868 = vmatprep.subr.bf16.mxu1 %v914_v14 }
  0x2b   : > { %847 = vmatpush3.bf16.msra.mxu0 %v915_v15  ;;  %876 = vmatpush3.bf16.msra.mxu1 %v915_v15 }
  0x2c   : > { %848 = vmatprep.subr.bf16.mxu0 %v916_v16  ;;  %869 = vmatprep.subr.bf16.mxu1 %v916_v16 }
  0x2f   : > { %849 = vmatpush3.bf16.msra.mxu0 %v917_v17  ;;  %877 = vmatpush3.bf16.msra.mxu1 %v917_v17 }
  0x32   : > { %516 = vmatmul.mubr.bf16.vlgmr.msra.gmra.mrb[0].mxu0 %v918_v18  ;;  %524 = vmatmul.mubr.bf16.vlgmr.msra.gmra.mrb[0].mxu1 %v921_v19 }
 0x105   : > { %v850_v20 = vpop.f32.mrb[0].mxu0  ;;  %v856_v21 = vpop.f32.mrb[0].mxu1 }
 0x106   : > { %v851_v22 = vpop.f32.mrb[1].mxu0  ;;  %v857_v24 = vpop.f32.mrb[1].mxu1 }
 0x107   : > { %v852_v25 = vadd.f32 %v851_v22, %v850_v20  ;;  %v853_v26 = vpop.f32.mrb[2].mxu0  ;;  %v858_v27 = vadd.f32 %v857_v24, %v856_v21  ;;  %v859_v28 = vpop.f32.mrb[2].mxu1 }
 0x108   : > { %v854_v29 = vpop.f32.mrb[3].mxu0  ;;  %v860_v30 = vpop.f32.mrb[3].mxu1 }
 0x109   : > { %v554_v31 = vadd.f32 %v852_v25, %v809_v23  ;;  %v556_v32 = vadd.f32 %v858_v27, %v809_v23  ;;  %v855_v33 = vadd.f32 %v854_v29, %v853_v26  ;;  %v861_v34 = vadd.f32 %v860_v30, %v859_v28 }
 0x10b   : > { %v555_v35 = vadd.f32 %v855_v33, %v809_v23  ;;  %v557_v36 = vadd.f32 %v861_v34, %v809_v23  ;;  %v606_v37 = vmul.f32 %v554_v31, %v554_v31  ;;  %v608_v38 = vmul.f32 %v556_v32, %v556_v32 }
 0x10d   : > { %v826_v39 = vpack.c.bf16 %v555_v35, %v554_v31  ;;  %v597_v40 = vadd.f32 %v555_v35, %v554_v31  ;;  %v607_v41 = vmul.f32 %v555_v35, %v555_v35  ;;  %v831_v42 = vpack.c.bf16 %v557_v36, %v556_v32 }
 0x10e   : > { %v609_v46 = vmul.f32 %v557_v36, %v557_v36 }
 0x10f   : > { %827 = vst [vmem:[%s309_s6] sm:$0xff] %v826_v39   ;;  %v610_v43 = vadd.f32 %v607_v41, %v606_v37  ;;  %833 = vst [vmem:[%s309_s6 + $0x8] sm:$0xff] %v831_v42   ;;  %v598_v44 = vadd.f32 %v597_v40, %v556_v32 }
 0x111   : > { %v599_v45 = vadd.f32 %v598_v44, %v557_v36  ;;  %v611_v47 = vadd.f32 %v610_v43, %v608_v38 }
 0x113   : > { %v600_v48 = vrot.slane %v599_v45, 4  ;;  %v612_v49 = vadd.f32 %v611_v47, %v609_v46 }
 0x115   : > { %v601_v50 = vadd.f32 %v600_v48, %v599_v45  ;;  %v613_v51 = vrot.slane %v612_v49, 4 }
 0x117   : > { %v602_v52 = vrot.slane %v601_v50, 2  ;;  %v614_v53 = vadd.f32 %v613_v51, %v612_v49 }
 0x119   : > { %v603_v54 = vadd.f32 %v602_v52, %v601_v50  ;;  %v615_v55 = vrot.slane %v614_v53, 2 }
 0x11b   : > { %v604_v56 = vrot.slane %v603_v54, 1  ;;  %v616_v57 = vadd.f32 %v615_v55, %v614_v53 }
 0x11d   : > { %v617_v58 = vrot.slane %v616_v57, 1  ;;  %v605_v59 = vadd.f32 %v604_v56, %v603_v54 }
 0x11f   : > { %v618_v60 = vadd.f32 %v617_v58, %v616_v57 }
 0x121   : > { %v620_v61 = vsel %vm619_vm0, %v605_v59, %v618_v60 }
 0x122   : > { %621 = vst [vmem:[%s317_s10] sm:$0x3] %v620_v61 }
 0x123 PF: > { %s15_s17 = sadd.s32 1, %s946_s17   ;;  %s1044_s15 = smov %s942_s16 }
 0x124   : > { %p12_p5 = scmp.ge.s32.totalorder %s15_s17, 6   ;;  %s1045_s16 = smov %s1047_s18 }
 0x126   :  { %14 = sbr.rel (!%p12_p5) target bundleno = 2 (0x2), region = 85 }

// kernel: _lambda_.10
= control target key start
LH: loop header
LB: loop body
LE: loop exit
PB: predicated region body
PF: predicated region fallthrough
CT: control target
= control target key end

     0   :  { %s1272_s15 = smov 0   ;;  %s1274_s16 = smov 0   ;;  %s1371_s0 = inlined_call_operand.vmem [shape: bf16[4,128,128], index: 0, kind: input, shape index: {}]   ;;  %s1372_s1 = inlined_call_operand.vmem [shape: bf16[4,128,128], index: 1, kind: input, shape index: {}]   ;;  %s1373_s2 = inlined_call_operand.vmem [shape: f32[1,128], index: 2, kind: input, shape index: {}]   ;;  %s1374_s3 = inlined_call_operand.vmem [shape: bf16[4,128,128], index: 3, kind: output, shape index: {0}]   ;;  %s1375_s4 = inlined_call_operand.vmem [shape: f32[4,1,2,128], index: 4, kind: output, shape index: {1}]  }
   0x1   :  { %s1276_s17 = smov 0  }
   0x2 LB: > { %s34_s18 = sadd.s32 1, %s1241_s16  ;;  %p1010_p0 = scmp.ge.s32.totalorder %s1245_s17, 1  ;;  %s1245_s17 = sphi %s1276_s17, %s15_s17   ;;  %s1241_s16 = sphi %s1274_s16, %s1377_s16   ;;  %s1237_s15 = sphi %s1272_s15, %s1376_s15  }
   0x3   : > { %p36_p1 = scmp.ge.s32.totalorder %s34_s18, 4  ;;  %p217_p2 = scmp.lt.s32.totalorder %s1245_s17, 5 }
   0x5   : > { %s1379_s18 = smov (%p36_p1, %s34_s18), 0  ;;  %p218_p3 = pnand %p1010_p0, %p217_p2 }
   0x6   : > { %p271_p4 = scmp.lt.s32.totalorder (!%p218_p3), %s1237_s15, 3  ;;  %v1034_v16 = vld [vmem:[%s1373_s2] ss:$0 sm:$0xff] (!%p218_p3)  ;;  %vm851_vm0 = vcmask (!%p218_p3), 1040384  }
   0x7   : > { %221 = sbr.rel (%p218_p3) target bundleno = 313 (0x139), region = 32 }
   0xe   : > { %s1381_s15 = smov (!%p271_p4, %s1237_s15), 3 }
   0xf   : > { %s1293_s19 = sshll.u32 %s1381_s15, 6  ;;  %s1017_s5 = sshll.u32 %s1381_s15, 1 }
  0x10   : > { %s1299_s22 = scalar_lea.vmem %s1372_s1, %s1293_s19  ;;  %s1308_s25 = scalar_lea.vmem %s1371_s0, %s1293_s19 }
  0x11   : > { %v1207_v0 = vld [vmem:[%s1299_s22] sm:$0xff]   ;;  %v1208_v1 = vld [vmem:[%s1299_s22 + $0x8] sm:$0xff]   ;;  %v1209_v2 = vld [vmem:[%s1299_s22 + $0x10] sm:$0xff]   ;;  %s1336_s30 = scalar_lea.vmem %s1374_s3, %s1293_s19  ;;  %s309_s8 = scalar_lea.vmem %s1375_s4, %s1017_s5 }
  0x12   : > { %1135 = vmatprep.subr.bf16.mxu0 %v1207_v0  ;;  %1167 = vmatprep.subr.bf16.mxu1 %v1207_v0  ;;  %v1210_v3 = vld [vmem:[%s1299_s22 + $0x18] sm:$0xff]   ;;  %v1215_v4 = vld [vmem:[%s1308_s25] sm:$0xff]   ;;  %v1212_v7 = vld [vmem:[%s1299_s22 + $0x28] sm:$0xff]  }
  0x13   : > { %1136 = vmatpush3.bf16.msra.mxu0 %v1207_v0  ;;  %1175 = vmatpush3.bf16.msra.mxu1 %v1207_v0  ;;  %v1211_v5 = vld [vmem:[%s1299_s22 + $0x20] sm:$0xff]   ;;  %v1213_v8 = vld [vmem:[%s1299_s22 + $0x30] sm:$0xff]   ;;  %v1214_v9 = vld [vmem:[%s1299_s22 + $0x38] sm:$0xff]  }
  0x14   : > { %1137 = vmatprep.subr.bf16.mxu0 %v1208_v1  ;;  %1168 = vmatprep.subr.bf16.mxu1 %v1208_v1  ;;  %v1219_v6 = vld [vmem:[%s1308_s25 + $0x20] sm:$0xff]   ;;  %v1216_v10 = vld [vmem:[%s1308_s25 + $0x8] sm:$0xff]   ;;  %v1217_v12 = vld [vmem:[%s1308_s25 + $0x10] sm:$0xff]  }
  0x15   : > { %1151 = vmatprep.mubr.bf16.mxu0 %v1215_v4  ;;  %1159 = vmatprep.mubr.bf16.mxu1 %v1219_v6  ;;  %v1220_v11 = vld [vmem:[%s1308_s25 + $0x28] sm:$0xff]   ;;  %v1221_v13 = vld [vmem:[%s1308_s25 + $0x30] sm:$0xff]   ;;  %v1218_v14 = vld [vmem:[%s1308_s25 + $0x18] sm:$0xff]  }
  0x16   : > { %v1222_v15 = vld [vmem:[%s1308_s25 + $0x38] sm:$0xff]  }
  0x17   : > { %1138 = vmatpush3.bf16.msra.mxu0 %v1208_v1  ;;  %1176 = vmatpush3.bf16.msra.mxu1 %v1208_v1 }
  0x18   : > { %1139 = vmatprep.subr.bf16.mxu0 %v1209_v2  ;;  %1169 = vmatprep.subr.bf16.mxu1 %v1209_v2 }
  0x1b   : > { %1140 = vmatpush3.bf16.msra.mxu0 %v1209_v2  ;;  %1177 = vmatpush3.bf16.msra.mxu1 %v1209_v2 }
  0x1c   : > { %1141 = vmatprep.subr.bf16.mxu0 %v1210_v3  ;;  %1170 = vmatprep.subr.bf16.mxu1 %v1210_v3 }
  0x1f   : > { %1142 = vmatpush3.bf16.msra.mxu0 %v1210_v3  ;;  %1178 = vmatpush3.bf16.msra.mxu1 %v1210_v3 }
  0x20   : > { %1143 = vmatprep.subr.bf16.mxu0 %v1211_v5  ;;  %1171 = vmatprep.subr.bf16.mxu1 %v1211_v5 }
  0x23   : > { %1144 = vmatpush3.bf16.msra.mxu0 %v1211_v5  ;;  %1179 = vmatpush3.bf16.msra.mxu1 %v1211_v5 }
  0x24   : > { %1145 = vmatprep.subr.bf16.mxu0 %v1212_v7  ;;  %1172 = vmatprep.subr.bf16.mxu1 %v1212_v7 }
  0x27   : > { %1146 = vmatpush3.bf16.msra.mxu0 %v1212_v7  ;;  %1180 = vmatpush3.bf16.msra.mxu1 %v1212_v7 }
  0x28   : > { %1147 = vmatprep.subr.bf16.mxu0 %v1213_v8  ;;  %1173 = vmatprep.subr.bf16.mxu1 %v1213_v8 }
  0x2b   : > { %1148 = vmatpush3.bf16.msra.mxu0 %v1213_v8  ;;  %1181 = vmatpush3.bf16.msra.mxu1 %v1213_v8 }
  0x2c   : > { %1149 = vmatprep.subr.bf16.mxu0 %v1214_v9  ;;  %1174 = vmatprep.subr.bf16.mxu1 %v1214_v9 }
  0x2f   : > { %1150 = vmatpush3.bf16.msra.mxu0 %v1214_v9  ;;  %1182 = vmatpush3.bf16.msra.mxu1 %v1214_v9 }
  0x32   : > { %1152 = vmatmul.mubr.bf16.vlgmr.msra.gmra.mrb[0].mxu0 %v1216_v10  ;;  %1160 = vmatmul.mubr.bf16.vlgmr.msra.gmra.mrb[0].mxu1 %v1220_v11 }
  0x33   : > { %1155 = vmatprep.mubr.bf16.mxu0 %v1217_v12  ;;  %1163 = vmatprep.mubr.bf16.mxu1 %v1221_v13 }
  0x3a   : > { %1156 = vmatmul.mubr.bf16.gmra.mrb[4].mxu0 %v1218_v14  ;;  %1164 = vmatmul.mubr.bf16.gmra.mrb[4].mxu1 %v1222_v15 }
 0x105   : > { %v1153_v17 = vpop.f32.mrb[0].mxu0  ;;  %v1161_v18 = vpop.f32.mrb[0].mxu1 }
 0x106   : > { %v509_v19 = vpop.f32.mrb[1].mxu0  ;;  %v1326_v20 = vadd.f32 %v1161_v18, %v1034_v16  ;;  %v541_v21 = vpop.f32.mrb[1].mxu1  ;;  %v632_v26 = vadd.f32 %v1153_v17, %v1034_v16 }
 0x107   : > { %v630_v22 = vadd.f32 %v1034_v16, %v509_v19  ;;  %v1154_v23 = vpop.f32.mrb[2].mxu0  ;;  %v1328_v24 = vadd.f32 %v1034_v16, %v541_v21  ;;  %v1162_v25 = vpop.f32.mrb[2].mxu1 }
 0x108   : > { %v633_v27 = vadd.f32 %v1154_v23, %v1034_v16  ;;  %v512_v28 = vpop.f32.mrb[3].mxu0  ;;  %v1330_v29 = vadd.f32 %v1162_v25, %v1034_v16  ;;  %v544_v30 = vpop.f32.mrb[3].mxu1  ;;  %v816_v40 = vmul.f32 %v632_v26, %v632_v26 }
 0x109   : > { %v631_v31 = vadd.f32 %v1034_v16, %v512_v28  ;;  %v639_v32 = vadd.f32 %v1034_v16, %v544_v30  ;;  %v814_v33 = vmul.f32 %v630_v22, %v630_v22  ;;  %v822_v14 = vmul.f32 %v1328_v24, %v1328_v24 }
 0x10a   : > { %v1080_v34 = vpack.c.bf16 %v633_v27, %v632_v26  ;;  %v1100_v35 = vpack.c.bf16 %v1330_v29, %v1326_v20  ;;  %v817_v48 = vmul.f32 %v633_v27, %v633_v27  ;;  %v825_v25 = vmul.f32 %v1330_v29, %v1330_v29 }
 0x10b   : > { %v1075_v36 = vpack.c.bf16 %v631_v31, %v630_v22  ;;  %v793_v37 = vadd.f32 %v631_v31, %v630_v22  ;;  %v815_v38 = vmul.f32 %v631_v31, %v631_v31  ;;  %v1095_v39 = vpack.c.bf16 %v639_v32, %v1328_v24 }
 0x10c   : > { %1112 = vst [vmem:[%s1336_s30 + $0x8] sm:$0xff] %v1080_v34   ;;  %1116 = vst [vmem:[%s1336_s30 + $0x28] sm:$0xff] %v1100_v35   ;;  %v823_v21 = vmul.f32 %v639_v32, %v639_v32 }
 0x10d   : > { %1076 = vst [vmem:[%s1336_s30] sm:$0xff] %v1075_v36   ;;  %v794_v41 = vadd.f32 %v793_v37, %v632_v26  ;;  %v830_v42 = vadd.f32 %v815_v38, %v814_v33  ;;  %v1157_v43 = vpop.f32.mrb[4].mxu0  ;;  %1115 = vst [vmem:[%s1336_s30 + $0x20] sm:$0xff] %v1095_v39   ;;  %v1165_v44 = vpop.f32.mrb[4].mxu1 }
 0x10e   : > { %v525_v45 = vpop.f32.mrb[5].mxu0  ;;  %v644_v46 = vadd.f32 %v1165_v44, %v1034_v16  ;;  %v557_v47 = vpop.f32.mrb[5].mxu1  ;;  %v636_v54 = vadd.f32 %v1157_v43, %v1034_v16 }
 0x10f   : > { %v831_v49 = vadd.f32 %v830_v42, %v816_v40  ;;  %v634_v50 = vadd.f32 %v1034_v16, %v525_v45  ;;  %v795_v51 = vadd.f32 %v794_v41, %v633_v27  ;;  %v1158_v52 = vpop.f32.mrb[6].mxu0  ;;  %v1166_v53 = vpop.f32.mrb[6].mxu1  ;;  %v642_v0 = vadd.f32 %v1034_v16, %v557_v47 }
 0x110   : > { %v637_v55 = vadd.f32 %v1158_v52, %v1034_v16  ;;  %v528_v56 = vpop.f32.mrb[7].mxu0  ;;  %v645_v57 = vadd.f32 %v1166_v53, %v1034_v16  ;;  %v560_v58 = vpop.f32.mrb[7].mxu1  ;;  %v820_v7 = vmul.f32 %v636_v54, %v636_v54  ;;  %v828_v35 = vmul.f32 %v644_v46, %v644_v46 }
 0x111   : > { %v796_v59 = vadd.f32 %v795_v51, %v634_v50  ;;  %v818_v60 = vmul.f32 %v634_v50, %v634_v50  ;;  %v832_v61 = vadd.f32 %v831_v49, %v817_v48  ;;  %v635_v62 = vadd.f32 %v1034_v16, %v528_v56 }
 0x112   : > { %v1090_v63 = vpack.c.bf16 %v637_v55, %v636_v54  ;;  %v1110_v1 = vpack.c.bf16 %v645_v57, %v644_v46  ;;  %v643_v6 = vadd.f32 %v1034_v16, %v560_v58  ;;  %v821_v11 = vmul.f32 %v637_v55, %v637_v55 }
 0x113   : > { %v833_v2 = vadd.f32 %v832_v61, %v818_v60  ;;  %v1085_v3 = vpack.c.bf16 %v635_v62, %v634_v50  ;;  %v797_v4 = vadd.f32 %v796_v59, %v635_v62  ;;  %v819_v5 = vmul.f32 %v635_v62, %v635_v62 }
 0x114   : > { %1114 = vst [vmem:[%s1336_s30 + $0x18] sm:$0xff] %v1090_v63   ;;  %1118 = vst [vmem:[%s1336_s30 + $0x38] sm:$0xff] %v1110_v1   ;;  %v1105_v10 = vpack.c.bf16 %v643_v6, %v642_v0  ;;  %v824_v16 = vmul.f32 %v1326_v20, %v1326_v20  ;;  %v826_v28 = vmul.f32 %v642_v0, %v642_v0 }
 0x115   : > { %1113 = vst [vmem:[%s1336_s30 + $0x10] sm:$0xff] %v1085_v3   ;;  %v798_v8 = vadd.f32 %v797_v4, %v636_v54  ;;  %v834_v9 = vadd.f32 %v833_v2, %v819_v5  ;;  %v827_v34 = vmul.f32 %v643_v6, %v643_v6  ;;  %v829_v37 = vmul.f32 %v645_v57, %v645_v57 }
 0x116   : > { %1117 = vst [vmem:[%s1336_s30 + $0x30] sm:$0xff] %v1105_v10  }
 0x117   : > { %v835_v12 = vadd.f32 %v834_v9, %v820_v7  ;;  %v799_v13 = vadd.f32 %v798_v8, %v637_v55 }
 0x119   : > { %v800_v15 = vadd.f32 %v799_v13, %v1328_v24  ;;  %v836_v17 = vadd.f32 %v835_v12, %v821_v11 }
 0x11b   : > { %v837_v18 = vadd.f32 %v836_v17, %v822_v14  ;;  %v801_v19 = vadd.f32 %v800_v15, %v639_v32 }
 0x11d   : > { %v802_v22 = vadd.f32 %v801_v19, %v1326_v20  ;;  %v838_v23 = vadd.f32 %v837_v18, %v823_v21 }
 0x11f   : > { %v839_v26 = vadd.f32 %v838_v23, %v824_v16  ;;  %v803_v27 = vadd.f32 %v802_v22, %v1330_v29 }
 0x121   : > { %v804_v30 = vadd.f32 %v803_v27, %v642_v0  ;;  %v840_v31 = vadd.f32 %v839_v26, %v825_v25 }
 0x123   : > { %v841_v24 = vadd.f32 %v840_v31, %v826_v28  ;;  %v805_v33 = vadd.f32 %v804_v30, %v643_v6 }
 0x125   : > { %v806_v32 = vadd.f32 %v805_v33, %v644_v46  ;;  %v842_v36 = vadd.f32 %v841_v24, %v827_v34 }
 0x127   : > { %v807_v38 = vadd.f32 %v806_v32, %v645_v57  ;;  %v843_v20 = vadd.f32 %v842_v36, %v828_v35 }
 0x129   : > { %v808_v39 = vrot.slane %v807_v38, 4  ;;  %v844_v40 = vadd.f32 %v843_v20, %v829_v37 }
 0x12b   : > { %v809_v41 = vadd.f32 %v808_v39, %v807_v38  ;;  %v845_v42 = vrot.slane %v844_v40, 4 }
 0x12d   : > { %v810_v43 = vrot.slane %v809_v41, 2  ;;  %v846_v44 = vadd.f32 %v845_v42, %v844_v40 }
 0x12f   : > { %v811_v29 = vadd.f32 %v810_v43, %v809_v41  ;;  %v847_v45 = vrot.slane %v846_v44, 2 }
 0x131   : > { %v812_v47 = vrot.slane %v811_v29, 1  ;;  %v848_v48 = vadd.f32 %v847_v45, %v846_v44 }
 0x133   : > { %v849_v49 = vrot.slane %v848_v48, 1  ;;  %v813_v46 = vadd.f32 %v812_v47, %v811_v29 }
 0x135   : > { %v850_v50 = vadd.f32 %v849_v49, %v848_v48 }
 0x137   : > { %v852_v51 = vsel %vm851_vm0, %v813_v46, %v850_v50 }
 0x138   : > { %853 = vst [vmem:[%s309_s8] sm:$0x3] %v852_v51 }
 0x139 PF: > { %s15_s17 = sadd.s32 1, %s1245_s17   ;;  %s1376_s15 = smov %s1241_s16 }
 0x13a   : > { %p12_p5 = scmp.ge.s32.totalorder %s15_s17, 6   ;;  %s1377_s16 = smov %s1379_s18 }
 0x13c   :  { %14 = sbr.rel (!%p12_p5) target bundleno = 2 (0x2), region = 85 }

// kernel: _lambda_.11
= control target key start
LH: loop header
LB: loop body
LE: loop exit
PB: predicated region body
PF: predicated region fallthrough
CT: control target
= control target key end

     0   :  { %s2515_s12 = smov 0   ;;  %s2517_s13 = smov 0   ;;  %s2706_s0 = inlined_call_operand.vmem [shape: bf16[4,512,128], index: 0, kind: input, shape index: {}]   ;;  %s2707_s1 = inlined_call_operand.vmem [shape: bf16[4,128,128], index: 1, kind: input, shape index: {}]   ;;  %s2708_s2 = inlined_call_operand.vmem [shape: f32[1,128], index: 2, kind: input, shape index: {}]   ;;  %s2709_s3 = inlined_call_operand.vmem [shape: bf16[4,512,128], index: 3, kind: output, shape index: {}]  }
   0x1   :  { %s2519_s14 = smov 0  }
   0x2 LB: > { %s32_s15 = sadd.s32 1, %s2489_s13  ;;  %p1771_p0 = scmp.ge.s32.totalorder %s2493_s14, 1  ;;  %s2493_s14 = sphi %s2519_s14, %s13_s14   ;;  %s2489_s13 = sphi %s2517_s13, %s2711_s13   ;;  %s2485_s12 = sphi %s2515_s12, %s2710_s12  }
   0x3   : > { %p34_p1 = scmp.ge.s32.totalorder %s32_s15, 4  ;;  %p187_p2 = scmp.lt.s32.totalorder %s2493_s14, 5 }
   0x5   : > { %s2713_s15 = smov (%p34_p1, %s32_s15), 0  ;;  %p188_p3 = pnand %p1771_p0, %p187_p2 }
   0x6   : > { %p232_p4 = scmp.lt.s32.totalorder (!%p188_p3), %s2485_s12, 3  ;;  %v2592_v40 = vld [vmem:[%s2708_s2] ss:$0 sm:$0xff] (!%p188_p3) }
   0x7   : > { %191 = sbr.rel (%p188_p3) target bundleno = 344 (0x158), region = 32 }
   0xe   : > { %s2715_s12 = smov (!%p232_p4, %s2485_s12), 3 }
   0xf   : > { %s1886_s16 = sshll.u32 %s2715_s12, 6  ;;  %s1885_s20 = sshll.u32 %s2715_s12, 8 }
  0x10   : > { %s2539_s19 = scalar_lea.vmem %s2707_s1, %s1886_s16  ;;  %s2550_s23 = scalar_lea.vmem %s2706_s0, %s1885_s20 }
  0x11   : > { %v2303_v0 = vld [vmem:[%s2539_s19] sm:$0xff]   ;;  %v2304_v1 = vld [vmem:[%s2539_s19 + $0x8] sm:$0xff]   ;;  %v2305_v2 = vld [vmem:[%s2539_s19 + $0x10] sm:$0xff]   ;;  %s2615_s28 = scalar_lea.vmem %s2709_s3, %s1885_s20 }
  0x12   : > { %2183 = vmatprep.subr.bf16.mxu0 %v2303_v0  ;;  %2263 = vmatprep.subr.bf16.mxu1 %v2303_v0  ;;  %v2306_v3 = vld [vmem:[%s2539_s19 + $0x18] sm:$0xff]   ;;  %v2311_v4 = vld [vmem:[%s2550_s23] sm:$0xff]   ;;  %v2308_v7 = vld [vmem:[%s2539_s19 + $0x28] sm:$0xff]  }
  0x13   : > { %2184 = vmatpush3.bf16.msra.mxu0 %v2303_v0  ;;  %2271 = vmatpush3.bf16.msra.mxu1 %v2303_v0  ;;  %v2312_v5 = vld [vmem:[%s2550_s23 + $0x80] sm:$0xff]   ;;  %v2309_v8 = vld [vmem:[%s2539_s19 + $0x30] sm:$0xff]   ;;  %v2310_v9 = vld [vmem:[%s2539_s19 + $0x38] sm:$0xff]  }
  0x14   : > { %2185 = vmatprep.subr.bf16.mxu0 %v2304_v1  ;;  %2264 = vmatprep.subr.bf16.mxu1 %v2304_v1  ;;  %v2307_v6 = vld [vmem:[%s2539_s19 + $0x20] sm:$0xff]   ;;  %v2313_v10 = vld [vmem:[%s2550_s23 + $0x8] sm:$0xff]   ;;  %v2315_v12 = vld [vmem:[%s2550_s23 + $0x10] sm:$0xff]  }
  0x15   : > { %2199 = vmatprep.mubr.bf16.mxu0 %v2311_v4  ;;  %2231 = vmatprep.mubr.bf16.mxu1 %v2312_v5  ;;  %v2314_v11 = vld [vmem:[%s2550_s23 + $0x88] sm:$0xff]   ;;  %v2316_v13 = vld [vmem:[%s2550_s23 + $0x90] sm:$0xff]   ;;  %v2317_v14 = vld [vmem:[%s2550_s23 + $0x18] sm:$0xff]  }
  0x16   : > { %v2318_v15 = vld [vmem:[%s2550_s23 + $0x98] sm:$0xff]   ;;  %v2319_v16 = vld [vmem:[%s2550_s23 + $0x20] sm:$0xff]   ;;  %v2321_v18 = vld [vmem:[%s2550_s23 + $0x28] sm:$0xff]  }
  0x17   : > { %2186 = vmatpush3.bf16.msra.mxu0 %v2304_v1  ;;  %2272 = vmatpush3.bf16.msra.mxu1 %v2304_v1  ;;  %v2320_v17 = vld [vmem:[%s2550_s23 + $0xa0] sm:$0xff]   ;;  %v2322_v19 = vld [vmem:[%s2550_s23 + $0xa8] sm:$0xff]   ;;  %v2323_v20 = vld [vmem:[%s2550_s23 + $0x30] sm:$0xff]  }
  0x18   : > { %2187 = vmatprep.subr.bf16.mxu0 %v2305_v2  ;;  %2265 = vmatprep.subr.bf16.mxu1 %v2305_v2  ;;  %v2324_v21 = vld [vmem:[%s2550_s23 + $0xb0] sm:$0xff]   ;;  %v2325_v22 = vld [vmem:[%s2550_s23 + $0x38] sm:$0xff]   ;;  %v2327_v24 = vld [vmem:[%s2550_s23 + $0x40] sm:$0xff]  }
  0x19   : > { %v2326_v23 = vld [vmem:[%s2550_s23 + $0xb8] sm:$0xff]   ;;  %v2328_v25 = vld [vmem:[%s2550_s23 + $0xc0] sm:$0xff]   ;;  %v2329_v26 = vld [vmem:[%s2550_s23 + $0x48] sm:$0xff]  }
  0x1a   : > { %v2330_v27 = vld [vmem:[%s2550_s23 + $0xc8] sm:$0xff]   ;;  %v2331_v28 = vld [vmem:[%s2550_s23 + $0x50] sm:$0xff]   ;;  %v2333_v30 = vld [vmem:[%s2550_s23 + $0x58] sm:$0xff]  }
  0x1b   : > { %2188 = vmatpush3.bf16.msra.mxu0 %v2305_v2  ;;  %2273 = vmatpush3.bf16.msra.mxu1 %v2305_v2  ;;  %v2332_v29 = vld [vmem:[%s2550_s23 + $0xd0] sm:$0xff]   ;;  %v2334_v31 = vld [vmem:[%s2550_s23 + $0xd8] sm:$0xff]   ;;  %v2335_v32 = vld [vmem:[%s2550_s23 + $0x60] sm:$0xff]  }
  0x1c   : > { %2189 = vmatprep.subr.bf16.mxu0 %v2306_v3  ;;  %2266 = vmatprep.subr.bf16.mxu1 %v2306_v3  ;;  %v2336_v33 = vld [vmem:[%s2550_s23 + $0xe0] sm:$0xff]   ;;  %v2337_v34 = vld [vmem:[%s2550_s23 + $0x68] sm:$0xff]   ;;  %v2339_v36 = vld [vmem:[%s2550_s23 + $0x70] sm:$0xff]  }
  0x1d   : > { %v2338_v35 = vld [vmem:[%s2550_s23 + $0xe8] sm:$0xff]   ;;  %v2340_v37 = vld [vmem:[%s2550_s23 + $0xf0] sm:$0xff]   ;;  %v2341_v38 = vld [vmem:[%s2550_s23 + $0x78] sm:$0xff]  }
  0x1e   : > { %v2342_v39 = vld [vmem:[%s2550_s23 + $0xf8] sm:$0xff]  }
  0x1f   : > { %2190 = vmatpush3.bf16.msra.mxu0 %v2306_v3  ;;  %2274 = vmatpush3.bf16.msra.mxu1 %v2306_v3 }
  0x20   : > { %2191 = vmatprep.subr.bf16.mxu0 %v2307_v6  ;;  %2267 = vmatprep.subr.bf16.mxu1 %v2307_v6 }
  0x23   : > { %2192 = vmatpush3.bf16.msra.mxu0 %v2307_v6  ;;  %2275 = vmatpush3.bf16.msra.mxu1 %v2307_v6 }
  0x24   : > { %2193 = vmatprep.subr.bf16.mxu0 %v2308_v7  ;;  %2268 = vmatprep.subr.bf16.mxu1 %v2308_v7 }
  0x27   : > { %2194 = vmatpush3.bf16.msra.mxu0 %v2308_v7  ;;  %2276 = vmatpush3.bf16.msra.mxu1 %v2308_v7 }
  0x28   : > { %2195 = vmatprep.subr.bf16.mxu0 %v2309_v8  ;;  %2269 = vmatprep.subr.bf16.mxu1 %v2309_v8 }
  0x2b   : > { %2196 = vmatpush3.bf16.msra.mxu0 %v2309_v8  ;;  %2277 = vmatpush3.bf16.msra.mxu1 %v2309_v8 }
  0x2c   : > { %2197 = vmatprep.subr.bf16.mxu0 %v2310_v9  ;;  %2270 = vmatprep.subr.bf16.mxu1 %v2310_v9 }
  0x2f   : > { %2198 = vmatpush3.bf16.msra.mxu0 %v2310_v9  ;;  %2278 = vmatpush3.bf16.msra.mxu1 %v2310_v9 }
  0x32   : > { %2200 = vmatmul.mubr.bf16.vlgmr.msra.gmra.mrb[0].mxu0 %v2313_v10  ;;  %2232 = vmatmul.mubr.bf16.vlgmr.msra.gmra.mrb[0].mxu1 %v2314_v11 }
  0x33   : > { %2203 = vmatprep.mubr.bf16.mxu0 %v2315_v12  ;;  %2235 = vmatprep.mubr.bf16.mxu1 %v2316_v13 }
  0x3a   : > { %2204 = vmatmul.mubr.bf16.gmra.mrb[4].mxu0 %v2317_v14  ;;  %2236 = vmatmul.mubr.bf16.gmra.mrb[4].mxu1 %v2318_v15 }
  0x3b   : > { %2207 = vmatprep.mubr.bf16.mxu0 %v2319_v16  ;;  %2239 = vmatprep.mubr.bf16.mxu1 %v2320_v17 }
  0x42   : > { %2208 = vmatmul.mubr.bf16.gmra.mrb[8].mxu0 %v2321_v18  ;;  %2240 = vmatmul.mubr.bf16.gmra.mrb[8].mxu1 %v2322_v19 }
  0x43   : > { %2211 = vmatprep.mubr.bf16.mxu0 %v2323_v20  ;;  %2243 = vmatprep.mubr.bf16.mxu1 %v2324_v21 }
  0x4a   : > { %2212 = vmatmul.mubr.bf16.gmra.mrb[12].mxu0 %v2325_v22  ;;  %2244 = vmatmul.mubr.bf16.gmra.mrb[12].mxu1 %v2326_v23 }
  0x4b   : > { %2215 = vmatprep.mubr.bf16.mxu0 %v2327_v24  ;;  %2247 = vmatprep.mubr.bf16.mxu1 %v2328_v25 }
  0x52   : > { %2216 = vmatmul.mubr.bf16.gmra.mrb[16].mxu0 %v2329_v26  ;;  %2248 = vmatmul.mubr.bf16.gmra.mrb[16].mxu1 %v2330_v27 }
  0x53   : > { %2219 = vmatprep.mubr.bf16.mxu0 %v2331_v28  ;;  %2251 = vmatprep.mubr.bf16.mxu1 %v2332_v29 }
  0x5a   : > { %2220 = vmatmul.mubr.bf16.gmra.mrb[20].mxu0 %v2333_v30  ;;  %2252 = vmatmul.mubr.bf16.gmra.mrb[20].mxu1 %v2334_v31 }
  0x5b   : > { %2223 = vmatprep.mubr.bf16.mxu0 %v2335_v32  ;;  %2255 = vmatprep.mubr.bf16.mxu1 %v2336_v33 }
  0x62   : > { %2224 = vmatmul.mubr.bf16.gmra.mrb[24].mxu0 %v2337_v34  ;;  %2256 = vmatmul.mubr.bf16.gmra.mrb[24].mxu1 %v2338_v35 }
  0x63   : > { %2227 = vmatprep.mubr.bf16.mxu0 %v2339_v36  ;;  %2259 = vmatprep.mubr.bf16.mxu1 %v2340_v37 }
  0x6a   : > { %2228 = vmatmul.mubr.bf16.gmra.mrb[28].mxu0 %v2341_v38  ;;  %2260 = vmatmul.mubr.bf16.gmra.mrb[28].mxu1 %v2342_v39 }
 0x105   : > { %v2201_v41 = vpop.f32.mrb[0].mxu0  ;;  %v2233_v42 = vpop.f32.mrb[0].mxu1 }
 0x106   : > { %v1210_v43 = vadd.f32 %v2201_v41, %v2592_v40  ;;  %v1242_v44 = vadd.f32 %v2233_v42, %v2592_v40  ;;  %v751_v45 = vpop.f32.mrb[1].mxu0  ;;  %v879_v46 = vpop.f32.mrb[1].mxu1 }
 0x107   : > { %v1208_v47 = vadd.f32 %v2592_v40, %v751_v45  ;;  %v1240_v48 = vadd.f32 %v2592_v40, %v879_v46  ;;  %v2202_v49 = vpop.f32.mrb[2].mxu0  ;;  %v2234_v50 = vpop.f32.mrb[2].mxu1 }
 0x108   : > { %2343 = vtanh.f32 %v1210_v43  ;;  %v1211_v51 = vadd.f32 %v2202_v49, %v2592_v40  ;;  %v754_v52 = vpop.f32.mrb[3].mxu0  ;;  %v882_v53 = vpop.f32.mrb[3].mxu1  ;;  %v1243_v54 = vadd.f32 %v2234_v50, %v2592_v40 }
 0x109   : > { %2345 = vtanh.f32 %v1242_v44  ;;  %v1209_v55 = vadd.f32 %v2592_v40, %v754_v52  ;;  %v1241_v56 = vadd.f32 %v2592_v40, %v882_v53 }
 0x10a   : > { %2347 = vtanh.f32 %v1208_v47 }
 0x10b   : > { %2349 = vtanh.f32 %v1240_v48 }
 0x10c   : > { %2351 = vtanh.f32 %v1211_v51 }
 0x10d   : > { %2353 = vtanh.f32 %v1243_v54  ;;  %v2205_v57 = vpop.f32.mrb[4].mxu0  ;;  %v2237_v58 = vpop.f32.mrb[4].mxu1 }
 0x10e   : > { %2355 = vtanh.f32 %v1209_v55  ;;  %v1214_v59 = vadd.f32 %v2205_v57, %v2592_v40  ;;  %v1246_v60 = vadd.f32 %v2237_v58, %v2592_v40  ;;  %v767_v61 = vpop.f32.mrb[5].mxu0  ;;  %v895_v62 = vpop.f32.mrb[5].mxu1 }
 0x10f   : > { %2357 = vtanh.f32 %v1241_v56  ;;  %v1212_v63 = vadd.f32 %v2592_v40, %v767_v61  ;;  %v1244_v0 = vadd.f32 %v2592_v40, %v895_v62  ;;  %v2206_v1 = vpop.f32.mrb[6].mxu0  ;;  %v2238_v2 = vpop.f32.mrb[6].mxu1 }
 0x110   : > { %2359 = vtanh.f32 %v1214_v59  ;;  %v1215_v3 = vadd.f32 %v2206_v1, %v2592_v40  ;;  %v770_v4 = vpop.f32.mrb[7].mxu0  ;;  %v898_v5 = vpop.f32.mrb[7].mxu1  ;;  %v1247_v6 = vadd.f32 %v2238_v2, %v2592_v40 }
 0x111   : > { %2361 = vtanh.f32 %v1246_v60  ;;  %v1213_v8 = vadd.f32 %v2592_v40, %v770_v4  ;;  %v1245_v10 = vadd.f32 %v2592_v40, %v898_v5 }
 0x112   : > { %v2344_v7 = vpop.eup %2343  ;;  %2363 = vtanh.f32 %v1212_v63 }
 0x113   : > { %v2346_v9 = vpop.eup %2345  ;;  %2365 = vtanh.f32 %v1244_v0 }
 0x114   : > { %v2348_v11 = vpop.eup %2347  ;;  %2367 = vtanh.f32 %v1215_v3 }
 0x115   : > { %v2350_v12 = vpop.eup %2349  ;;  %2369 = vtanh.f32 %v1247_v6  ;;  %v2209_v13 = vpop.f32.mrb[8].mxu0 }
 0x116   : > { %v2241_v14 = vpop.f32.mrb[8].mxu1  ;;  %v2352_v15 = vpop.eup %2351  ;;  %2371 = vtanh.f32 %v1213_v8  ;;  %v1218_v16 = vadd.f32 %v2209_v13, %v2592_v40 }
 0x117   : > { %v1250_v17 = vadd.f32 %v2241_v14, %v2592_v40  ;;  %v783_v18 = vpop.f32.mrb[9].mxu0  ;;  %v911_v19 = vpop.f32.mrb[9].mxu1  ;;  %v1960_v21 = vpack.c.bf16 %v2352_v15, %v2344_v7  ;;  %2373 = vtanh.f32 %v1245_v10 }
 0x118   : > { %v2354_v20 = vpop.eup %2353  ;;  %v1216_v22 = vadd.f32 %v2592_v40, %v783_v18  ;;  %v1248_v23 = vadd.f32 %v2592_v40, %v911_v19  ;;  %v2210_v24 = vpop.f32.mrb[10].mxu0  ;;  %2375 = vtanh.f32 %v1218_v16 }
 0x119   : > { %v2242_v25 = vpop.f32.mrb[10].mxu1  ;;  %v2356_v26 = vpop.eup %2355  ;;  %v2040_v27 = vpack.c.bf16 %v2354_v20, %v2346_v9  ;;  %v1219_v28 = vadd.f32 %v2210_v24, %v2592_v40  ;;  %2112 = vst [vmem:[%s2615_s28 + $0x8] sm:$0xff] %v1960_v21   ;;  %2377 = vtanh.f32 %v1250_v17 }
 0x11a   : > { %v786_v29 = vpop.f32.mrb[11].mxu0  ;;  %v914_v30 = vpop.f32.mrb[11].mxu1  ;;  %v1955_v32 = vpack.c.bf16 %v2356_v26, %v2348_v11  ;;  %v1251_v33 = vadd.f32 %v2242_v25, %v2592_v40  ;;  %2379 = vtanh.f32 %v1216_v22 }
 0x11b   : > { %v2358_v31 = vpop.eup %2357  ;;  %2128 = vst [vmem:[%s2615_s28 + $0x88] sm:$0xff] %v2040_v27   ;;  %v1217_v36 = vadd.f32 %v2592_v40, %v786_v29  ;;  %2381 = vtanh.f32 %v1248_v23  ;;  %v1249_v38 = vadd.f32 %v2592_v40, %v914_v30 }
 0x11c   : > { %v2360_v34 = vpop.eup %2359  ;;  %v2035_v35 = vpack.c.bf16 %v2358_v31, %v2350_v12  ;;  %1956 = vst [vmem:[%s2615_s28] sm:$0xff] %v1955_v32   ;;  %2383 = vtanh.f32 %v1219_v28 }
 0x11d   : > { %v2362_v37 = vpop.eup %2361  ;;  %2385 = vtanh.f32 %v1251_v33  ;;  %v2213_v42 = vpop.f32.mrb[12].mxu0 }
 0x11e   : > { %v2364_v39 = vpop.eup %2363  ;;  %2127 = vst [vmem:[%s2615_s28 + $0x80] sm:$0xff] %v2035_v35   ;;  %v2245_v43 = vpop.f32.mrb[12].mxu1  ;;  %2387 = vtanh.f32 %v1217_v36  ;;  %v1222_v45 = vadd.f32 %v2213_v42, %v2592_v40 }
 0x11f   : > { %v2366_v41 = vpop.eup %2365  ;;  %v1254_v46 = vadd.f32 %v2245_v43, %v2592_v40  ;;  %v799_v47 = vpop.f32.mrb[13].mxu0  ;;  %2389 = vtanh.f32 %v1249_v38 }
 0x120   : > { %v2368_v44 = vpop.eup %2367  ;;  %v927_v48 = vpop.f32.mrb[13].mxu1  ;;  %v1220_v51 = vadd.f32 %v2592_v40, %v799_v47  ;;  %2391 = vtanh.f32 %v1222_v45 }
 0x121   : > { %v2370_v49 = vpop.eup %2369  ;;  %v1970_v50 = vpack.c.bf16 %v2368_v44, %v2360_v34  ;;  %v1252_v52 = vadd.f32 %v2592_v40, %v927_v48  ;;  %v2214_v53 = vpop.f32.mrb[14].mxu0  ;;  %2393 = vtanh.f32 %v1254_v46 }
 0x122   : > { %v2246_v54 = vpop.f32.mrb[14].mxu1  ;;  %v2372_v55 = vpop.eup %2371  ;;  %v2050_v56 = vpack.c.bf16 %v2370_v49, %v2362_v37  ;;  %v1223_v57 = vadd.f32 %v2214_v53, %v2592_v40  ;;  %2395 = vtanh.f32 %v1220_v51 }
 0x123   : > { %v802_v58 = vpop.f32.mrb[15].mxu0  ;;  %v930_v59 = vpop.f32.mrb[15].mxu1  ;;  %2114 = vst [vmem:[%s2615_s28 + $0x18] sm:$0xff] %v1970_v50   ;;  %v1965_v61 = vpack.c.bf16 %v2372_v55, %v2364_v39  ;;  %v1255_v62 = vadd.f32 %v2246_v54, %v2592_v40  ;;  %2397 = vtanh.f32 %v1252_v52 }
 0x124   : > { %v2374_v60 = vpop.eup %2373  ;;  %2130 = vst [vmem:[%s2615_s28 + $0x98] sm:$0xff] %v2050_v56   ;;  %v1221_v1 = vadd.f32 %v2592_v40, %v802_v58  ;;  %v1253_v3 = vadd.f32 %v2592_v40, %v930_v59  ;;  %2399 = vtanh.f32 %v1223_v57 }
 0x125   : > { %v2376_v63 = vpop.eup %2375  ;;  %v2045_v0 = vpack.c.bf16 %v2374_v60, %v2366_v41  ;;  %2113 = vst [vmem:[%s2615_s28 + $0x10] sm:$0xff] %v1965_v61   ;;  %2401 = vtanh.f32 %v1255_v62  ;;  %v2217_v6 = vpop.f32.mrb[16].mxu0 }
 0x126   : > { %v2378_v2 = vpop.eup %2377  ;;  %v2249_v7 = vpop.f32.mrb[16].mxu1  ;;  %2403 = vtanh.f32 %v1221_v1  ;;  %v1226_v9 = vadd.f32 %v2217_v6, %v2592_v40 }
 0x127   : > { %v2380_v4 = vpop.eup %2379  ;;  %2129 = vst [vmem:[%s2615_s28 + $0x90] sm:$0xff] %v2045_v0   ;;  %v1258_v10 = vadd.f32 %v2249_v7, %v2592_v40  ;;  %v815_v11 = vpop.f32.mrb[17].mxu0  ;;  %2405 = vtanh.f32 %v1253_v3 }
 0x128   : > { %v2382_v5 = vpop.eup %2381  ;;  %v943_v12 = vpop.f32.mrb[17].mxu1  ;;  %v1224_v15 = vadd.f32 %v2592_v40, %v815_v11  ;;  %2407 = vtanh.f32 %v1226_v9 }
 0x129   : > { %v2384_v8 = vpop.eup %2383  ;;  %v1256_v16 = vadd.f32 %v2592_v40, %v943_v12  ;;  %v2218_v17 = vpop.f32.mrb[18].mxu0  ;;  %2409 = vtanh.f32 %v1258_v10 }
 0x12a   : > { %v2386_v13 = vpop.eup %2385  ;;  %v1980_v14 = vpack.c.bf16 %v2384_v8, %v2376_v63  ;;  %v2250_v18 = vpop.f32.mrb[18].mxu1  ;;  %v1227_v21 = vadd.f32 %v2218_v17, %v2592_v40  ;;  %2411 = vtanh.f32 %v1224_v15 }
 0x12b   : > { %v2388_v19 = vpop.eup %2387  ;;  %v2060_v20 = vpack.c.bf16 %v2386_v13, %v2378_v2  ;;  %v818_v22 = vpop.f32.mrb[19].mxu0  ;;  %v1259_v26 = vadd.f32 %v2250_v18, %v2592_v40  ;;  %2413 = vtanh.f32 %v1256_v16 }
 0x12c   : > { %v946_v23 = vpop.f32.mrb[19].mxu1  ;;  %v2390_v24 = vpop.eup %2389  ;;  %2116 = vst [vmem:[%s2615_s28 + $0x28] sm:$0xff] %v1980_v14   ;;  %v1975_v25 = vpack.c.bf16 %v2388_v19, %v2380_v4  ;;  %v1225_v29 = vadd.f32 %v2592_v40, %v818_v22  ;;  %2415 = vtanh.f32 %v1227_v21 }
 0x12d   : > { %v2392_v27 = vpop.eup %2391  ;;  %2132 = vst [vmem:[%s2615_s28 + $0xa8] sm:$0xff] %v2060_v20   ;;  %v2055_v28 = vpack.c.bf16 %v2390_v24, %v2382_v5  ;;  %v1257_v31 = vadd.f32 %v2592_v40, %v946_v23  ;;  %2417 = vtanh.f32 %v1259_v26  ;;  %v2221_v34 = vpop.f32.mrb[20].mxu0 }
 0x12e   : > { %v2394_v30 = vpop.eup %2393  ;;  %2115 = vst [vmem:[%s2615_s28 + $0x20] sm:$0xff] %v1975_v25   ;;  %v2253_v35 = vpop.f32.mrb[20].mxu1  ;;  %2419 = vtanh.f32 %v1225_v29  ;;  %v1230_v37 = vadd.f32 %v2221_v34, %v2592_v40 }
 0x12f   : > { %v2396_v32 = vpop.eup %2395  ;;  %2131 = vst [vmem:[%s2615_s28 + $0xa0] sm:$0xff] %v2055_v28   ;;  %v1262_v38 = vadd.f32 %v2253_v35, %v2592_v40  ;;  %v831_v39 = vpop.f32.mrb[21].mxu0  ;;  %2421 = vtanh.f32 %v1257_v31 }
 0x130   : > { %v2398_v33 = vpop.eup %2397  ;;  %v959_v41 = vpop.f32.mrb[21].mxu1  ;;  %v1228_v44 = vadd.f32 %v2592_v40, %v831_v39  ;;  %2423 = vtanh.f32 %v1230_v37 }
 0x131   : > { %v2400_v36 = vpop.eup %2399  ;;  %v1260_v45 = vadd.f32 %v2592_v40, %v959_v41  ;;  %v2222_v46 = vpop.f32.mrb[22].mxu0  ;;  %2425 = vtanh.f32 %v1262_v38 }
 0x132   : > { %v2402_v42 = vpop.eup %2401  ;;  %v1990_v43 = vpack.c.bf16 %v2400_v36, %v2392_v27  ;;  %v2254_v47 = vpop.f32.mrb[22].mxu1  ;;  %v1231_v50 = vadd.f32 %v2222_v46, %v2592_v40  ;;  %2427 = vtanh.f32 %v1228_v44 }
 0x133   : > { %v2404_v48 = vpop.eup %2403  ;;  %v2070_v49 = vpack.c.bf16 %v2402_v42, %v2394_v30  ;;  %v834_v51 = vpop.f32.mrb[23].mxu0  ;;  %v1263_v55 = vadd.f32 %v2254_v47, %v2592_v40  ;;  %2429 = vtanh.f32 %v1260_v45 }
 0x134   : > { %v962_v52 = vpop.f32.mrb[23].mxu1  ;;  %v2406_v53 = vpop.eup %2405  ;;  %2118 = vst [vmem:[%s2615_s28 + $0x38] sm:$0xff] %v1990_v43   ;;  %v1985_v54 = vpack.c.bf16 %v2404_v48, %v2396_v32  ;;  %v1229_v58 = vadd.f32 %v2592_v40, %v834_v51  ;;  %2431 = vtanh.f32 %v1231_v50 }
 0x135   : > { %v2408_v56 = vpop.eup %2407  ;;  %2134 = vst [vmem:[%s2615_s28 + $0xb8] sm:$0xff] %v2070_v49   ;;  %v2065_v57 = vpack.c.bf16 %v2406_v53, %v2398_v33  ;;  %v1261_v60 = vadd.f32 %v2592_v40, %v962_v52  ;;  %2433 = vtanh.f32 %v1263_v55  ;;  %v2225_v63 = vpop.f32.mrb[24].mxu0 }
 0x136   : > { %v2410_v59 = vpop.eup %2409  ;;  %2117 = vst [vmem:[%s2615_s28 + $0x30] sm:$0xff] %v1985_v54   ;;  %v2257_v0 = vpop.f32.mrb[24].mxu1  ;;  %2435 = vtanh.f32 %v1229_v58  ;;  %v1234_v2 = vadd.f32 %v2225_v63, %v2592_v40 }
 0x137   : > { %v2412_v61 = vpop.eup %2411  ;;  %2133 = vst [vmem:[%s2615_s28 + $0xb0] sm:$0xff] %v2065_v57   ;;  %v1266_v3 = vadd.f32 %v2257_v0, %v2592_v40  ;;  %v847_v4 = vpop.f32.mrb[25].mxu0  ;;  %2437 = vtanh.f32 %v1261_v60 }
 0x138   : > { %v2414_v62 = vpop.eup %2413  ;;  %v975_v5 = vpop.f32.mrb[25].mxu1  ;;  %v1232_v8 = vadd.f32 %v2592_v40, %v847_v4  ;;  %2439 = vtanh.f32 %v1234_v2 }
 0x139   : > { %v2416_v1 = vpop.eup %2415  ;;  %v1264_v9 = vadd.f32 %v2592_v40, %v975_v5  ;;  %v2226_v10 = vpop.f32.mrb[26].mxu0  ;;  %2441 = vtanh.f32 %v1266_v3 }
 0x13a   : > { %v2418_v6 = vpop.eup %2417  ;;  %v2000_v7 = vpack.c.bf16 %v2416_v1, %v2408_v56  ;;  %v2258_v11 = vpop.f32.mrb[26].mxu1  ;;  %v1235_v14 = vadd.f32 %v2226_v10, %v2592_v40  ;;  %2443 = vtanh.f32 %v1232_v8 }
 0x13b   : > { %v2420_v12 = vpop.eup %2419  ;;  %v2080_v13 = vpack.c.bf16 %v2418_v6, %v2410_v59  ;;  %v850_v15 = vpop.f32.mrb[27].mxu0  ;;  %v1267_v19 = vadd.f32 %v2258_v11, %v2592_v40  ;;  %2445 = vtanh.f32 %v1264_v9 }
 0x13c   : > { %v978_v16 = vpop.f32.mrb[27].mxu1  ;;  %v2422_v17 = vpop.eup %2421  ;;  %2120 = vst [vmem:[%s2615_s28 + $0x48] sm:$0xff] %v2000_v7   ;;  %v1995_v18 = vpack.c.bf16 %v2420_v12, %v2412_v61  ;;  %v1233_v22 = vadd.f32 %v2592_v40, %v850_v15  ;;  %2447 = vtanh.f32 %v1235_v14 }
 0x13d   : > { %v2424_v20 = vpop.eup %2423  ;;  %2136 = vst [vmem:[%s2615_s28 + $0xc8] sm:$0xff] %v2080_v13   ;;  %v2075_v21 = vpack.c.bf16 %v2422_v17, %v2414_v62  ;;  %v1265_v24 = vadd.f32 %v2592_v40, %v978_v16  ;;  %2449 = vtanh.f32 %v1267_v19  ;;  %v2229_v27 = vpop.f32.mrb[28].mxu0 }
 0x13e   : > { %v2426_v23 = vpop.eup %2425  ;;  %2119 = vst [vmem:[%s2615_s28 + $0x40] sm:$0xff] %v1995_v18   ;;  %v2261_v28 = vpop.f32.mrb[28].mxu1  ;;  %2451 = vtanh.f32 %v1233_v22  ;;  %v1238_v30 = vadd.f32 %v2229_v27, %v2592_v40 }
 0x13f   : > { %v2428_v25 = vpop.eup %2427  ;;  %2135 = vst [vmem:[%s2615_s28 + $0xc0] sm:$0xff] %v2075_v21   ;;  %v1270_v31 = vadd.f32 %v2261_v28, %v2592_v40  ;;  %v863_v32 = vpop.f32.mrb[29].mxu0  ;;  %2453 = vtanh.f32 %v1265_v24 }
 0x140   : > { %v2430_v26 = vpop.eup %2429  ;;  %v991_v33 = vpop.f32.mrb[29].mxu1  ;;  %v1236_v36 = vadd.f32 %v2592_v40, %v863_v32  ;;  %2455 = vtanh.f32 %v1238_v30 }
 0x141   : > { %v2432_v29 = vpop.eup %2431  ;;  %v1268_v37 = vadd.f32 %v2592_v40, %v991_v33  ;;  %v2230_v38 = vpop.f32.mrb[30].mxu0  ;;  %2457 = vtanh.f32 %v1270_v31 }
 0x142   : > { %v2434_v34 = vpop.eup %2433  ;;  %v2010_v35 = vpack.c.bf16 %v2432_v29, %v2424_v20  ;;  %v2262_v39 = vpop.f32.mrb[30].mxu1  ;;  %v1239_v43 = vadd.f32 %v2230_v38, %v2592_v40  ;;  %2459 = vtanh.f32 %v1236_v36 }
 0x143   : > { %v2436_v41 = vpop.eup %2435  ;;  %v2090_v42 = vpack.c.bf16 %v2434_v34, %v2426_v23  ;;  %v866_v44 = vpop.f32.mrb[31].mxu0  ;;  %v1271_v48 = vadd.f32 %v2262_v39, %v2592_v40  ;;  %2461 = vtanh.f32 %v1268_v37 }
 0x144   : > { %v994_v45 = vpop.f32.mrb[31].mxu1  ;;  %v2438_v46 = vpop.eup %2437  ;;  %2122 = vst [vmem:[%s2615_s28 + $0x58] sm:$0xff] %v2010_v35   ;;  %v2005_v47 = vpack.c.bf16 %v2436_v41, %v2428_v25  ;;  %v1237_v51 = vadd.f32 %v2592_v40, %v866_v44  ;;  %2463 = vtanh.f32 %v1239_v43 }
 0x145   : > { %v2440_v49 = vpop.eup %2439  ;;  %2138 = vst [vmem:[%s2615_s28 + $0xd8] sm:$0xff] %v2090_v42   ;;  %v2085_v50 = vpack.c.bf16 %v2438_v46, %v2430_v26  ;;  %v1269_v53 = vadd.f32 %v2592_v40, %v994_v45  ;;  %2465 = vtanh.f32 %v1271_v48 }
 0x146   : > { %v2442_v52 = vpop.eup %2441  ;;  %2121 = vst [vmem:[%s2615_s28 + $0x50] sm:$0xff] %v2005_v47   ;;  %2467 = vtanh.f32 %v1237_v51 }
 0x147   : > { %v2444_v54 = vpop.eup %2443  ;;  %2137 = vst [vmem:[%s2615_s28 + $0xd0] sm:$0xff] %v2085_v50   ;;  %2469 = vtanh.f32 %v1269_v53 }
 0x148   : > { %v2446_v55 = vpop.eup %2445 }
 0x149   : > { %v2448_v56 = vpop.eup %2447 }
 0x14a   : > { %v2450_v57 = vpop.eup %2449  ;;  %v2020_v58 = vpack.c.bf16 %v2448_v56, %v2440_v49 }
 0x14b   : > { %v2452_v59 = vpop.eup %2451  ;;  %v2100_v60 = vpack.c.bf16 %v2450_v57, %v2442_v52 }
 0x14c   : > { %v2454_v61 = vpop.eup %2453  ;;  %2124 = vst [vmem:[%s2615_s28 + $0x68] sm:$0xff] %v2020_v58   ;;  %v2015_v62 = vpack.c.bf16 %v2452_v59, %v2444_v54 }
 0x14d   : > { %v2456_v40 = vpop.eup %2455  ;;  %2140 = vst [vmem:[%s2615_s28 + $0xe8] sm:$0xff] %v2100_v60   ;;  %v2095_v63 = vpack.c.bf16 %v2454_v61, %v2446_v55 }
 0x14e   : > { %v2458_v0 = vpop.eup %2457  ;;  %2123 = vst [vmem:[%s2615_s28 + $0x60] sm:$0xff] %v2015_v62  }
 0x14f   : > { %v2460_v1 = vpop.eup %2459  ;;  %2139 = vst [vmem:[%s2615_s28 + $0xe0] sm:$0xff] %v2095_v63  }
 0x150   : > { %v2462_v2 = vpop.eup %2461 }
 0x151   : > { %v2464_v3 = vpop.eup %2463 }
 0x152   : > { %v2466_v4 = vpop.eup %2465  ;;  %v2030_v5 = vpack.c.bf16 %v2464_v3, %v2456_v40 }
 0x153   : > { %v2468_v6 = vpop.eup %2467  ;;  %v2110_v7 = vpack.c.bf16 %v2466_v4, %v2458_v0 }
 0x154   : > { %v2470_v8 = vpop.eup %2469  ;;  %2126 = vst [vmem:[%s2615_s28 + $0x78] sm:$0xff] %v2030_v5   ;;  %v2025_v9 = vpack.c.bf16 %v2468_v6, %v2460_v1 }
 0x155   : > { %2142 = vst [vmem:[%s2615_s28 + $0xf8] sm:$0xff] %v2110_v7   ;;  %v2105_v10 = vpack.c.bf16 %v2470_v8, %v2462_v2 }
 0x156   : > { %2125 = vst [vmem:[%s2615_s28 + $0x70] sm:$0xff] %v2025_v9  }
 0x157   : > { %2141 = vst [vmem:[%s2615_s28 + $0xf0] sm:$0xff] %v2105_v10  }
 0x158 PF: > { %s13_s14 = sadd.s32 1, %s2493_s14   ;;  %s2710_s12 = smov %s2489_s13 }
 0x159   : > { %p10_p5 = scmp.ge.s32.totalorder %s13_s14, 6   ;;  %s2711_s13 = smov %s2713_s15 }
 0x15b   :  { %12 = sbr.rel (!%p10_p5) target bundleno = 2 (0x2), region = 73 }

</bundles_post_ra>
